<compile_context>
chip_gen: v6e
topology: v6e:2x2x1
jax: 0.10.0
libtpu: 0.0.40
codegen_flags: <defaults>
</compile_context>

<pallas_src>
import functools

import jax
import jax.numpy as jnp
from jax.experimental import pallas as pl
from jax.experimental.pallas import tpu as pltpu


def _grpo_kernel(w_ref, h_ref, tgt_ref, reflp_ref, adv_ref,
                 pi_ref, loss_ref, pol_ref, kl_ref,
                 m_acc, s_acc, t_acc,
                 *, kl_coeff: float, ignore_index: int):
    """One (token_chunk i, vocab_block j) grid step of the fused linear+GRPO loss.

    w_ref:   (TV, E)  bf16 weight tile        h_ref: (TT, E) bf16 hidden chunk
    tgt/reflp/adv refs: (1, 1, TT)            outputs: (1, 1, TT) f32
    m_acc/s_acc/t_acc: (1, TT) f32 VMEM scratch (online-LSE accumulators).
    """
    j = pl.program_id(1)
    nv = pl.num_programs(1)
    tv = w_ref.shape[0]

    @pl.when(j == 0)
    def _init():
        m_acc[...] = jnp.full_like(m_acc, -jnp.inf)
        s_acc[...] = jnp.zeros_like(s_acc)
        t_acc[...] = jnp.zeros_like(t_acc)

    # [TV, E] x [TT, E]^T -> [TV, TT] on the MXU (bf16 in, f32 accumulate).
    # Vocab on sublanes / tokens on lanes => per-token reductions are sublane
    # reductions and come out lane-dense (1, TT).
    logits = jax.lax.dot_general(
        w_ref[...], h_ref[...], (((1,), (1,)), ((), ())),
        preferred_element_type=jnp.float32)                     # (TV, TT)

    tgt_row = tgt_ref[0]                                        # (1, TT) int32
    vocab_ids = j * tv + jax.lax.broadcasted_iota(jnp.int32, (tv, 1), 0)

    # ---- online logsumexp + target-logit gather for this vocab block ----
    blk_max = jnp.max(logits, axis=0, keepdims=True)            # (1, TT)
    m_old = m_acc[...]
    m_new = jnp.maximum(m_old, blk_max)
    s_acc[...] = (s_acc[...] * jnp.exp(m_old - m_new)
                  + jnp.sum(jnp.exp(logits - m_new), axis=0, keepdims=True))
    t_acc[...] = t_acc[...] + jnp.sum(
        jnp.where(vocab_ids == tgt_row, logits, 0.0), axis=0, keepdims=True)
    m_acc[...] = m_new

    # ---- finalize on the last vocab block: GRPO per-token terms ----
    @pl.when(j == nv - 1)
    def _finalize():
        lse = m_acc[...] + jnp.log(s_acc[...])                  # (1, TT)
        pi_lp = t_acc[...] - lse
        # F.cross_entropy(reduction='none') yields 0 loss for ignore_index.
        pi_lp = jnp.where(tgt_row == ignore_index, 0.0, pi_lp)

        ref_lp = reflp_ref[0]                                   # (1, TT)
        adv = adv_ref[0]                                        # (1, TT)
        diff = ref_lp - pi_lp
        per_token_kl = jnp.exp(diff) - diff - 1.0
        per_token_policy = jnp.exp(pi_lp - jax.lax.stop_gradient(pi_lp)) * adv
        per_token_loss = -(per_token_policy - kl_coeff * per_token_kl)

        pi_ref[0] = pi_lp
        loss_ref[0] = per_token_loss
        pol_ref[0] = per_token_policy
        kl_ref[0] = per_token_kl


def _pick_vocab_block(vocab_size: int, target: int = 1024) -> int:
    """Largest multiple-of-128 divisor of V not exceeding `target` (else V)."""
    if vocab_size <= target:
        return vocab_size
    for tv in range(target - target % 128, 127, -128):
        if vocab_size % tv == 0:
            return tv
    return vocab_size


def linear_grpo_loss(weight, outputs, targets, ref_logprobs, advantages,
                     padding_masks=None, *, num_output_chunks=8,
                     epsilon=0.1, kl_coeff=0.1, ignore_index=-100,
                     vocab_block=None, vmem_limit_bytes=48 * 1024 * 1024):
    """JAX/Pallas equivalent of LinearGRPOLoss.forward.

    weight:       [V, E]      outputs:  [B, S, E]     targets: [B, S] int
    ref_logprobs: [B, S]      advantages: [B]         padding_masks: [B, S] bool
    Returns (loss, policy_loss, kl_loss, ratios, clipfrac, pi_logprobs[B, S]).
    """
    B, S, E = outputs.shape
    V = weight.shape[0]
    T = B * S
    assert T % num_output_chunks == 0, "B*S must divide num_output_chunks"
    TT = T // num_output_chunks
    assert TT % 8 == 0, "tokens-per-chunk must be a multiple of 8 (ideally 128)"
    # TODO(synk): pad T / V for ragged shapes instead of asserting.

    if vocab_block is None:
        vocab_block = _pick_vocab_block(V)
    assert V % vocab_block == 0, "vocab_block must divide vocab size"
    n_vblocks = V // vocab_block

    # bf16 operands for the MXU (accumulation stays f32 inside the kernel).
    w_bf = weight.astype(jnp.bfloat16)
    h_bf = outputs.reshape(T, E).astype(jnp.bfloat16)

    # Lane-dense (chunk, 1, TT) per-token scalars.
    tgt = targets.reshape(num_output_chunks, 1, TT).astype(jnp.int32)
    reflp = ref_logprobs.reshape(num_output_chunks, 1, TT).astype(jnp.float32)
    adv = jnp.broadcast_to(
        advantages.reshape(B, 1).astype(jnp.float32), (B, S)
    ).reshape(num_output_chunks, 1, TT)

    kernel = functools.partial(_grpo_kernel, kl_coeff=float(kl_coeff),
                               ignore_index=int(ignore_index))

    tok_spec = pl.BlockSpec((1, 1, TT), lambda i, j: (i, 0, 0))
    out_shape = tuple(
        jax.ShapeDtypeStruct((num_output_chunks, 1, TT), jnp.float32)
        for _ in range(4))

    pi_lp, per_loss, per_pol, per_kl = pl.pallas_call(
        kernel,
        out_shape=out_shape,
        grid_spec=pltpu.PrefetchScalarGridSpec(
            num_scalar_prefetch=0,
            grid=(num_output_chunks, n_vblocks),
            in_specs=[
                pl.BlockSpec((vocab_block, E), lambda i, j: (j, 0)),  # weight tile
                pl.BlockSpec((TT, E), lambda i, j: (i, 0)),           # hidden chunk
                tok_spec,   # targets
                tok_spec,   # ref logprobs
                tok_spec,   # per-token advantages
            ],
            out_specs=[tok_spec, tok_spec, tok_spec, tok_spec],
            scratch_shapes=[pltpu.VMEM((1, TT), jnp.float32),   # running max
                            pltpu.VMEM((1, TT), jnp.float32),   # running exp-sum
                            pltpu.VMEM((1, TT), jnp.float32)],  # target logit
        ),
        compiler_params=pltpu.CompilerParams(
            dimension_semantics=("parallel", "arbitrary"),
            vmem_limit_bytes=vmem_limit_bytes),
    )(w_bf, h_bf, tgt, reflp, adv)

    pi_logprobs = pi_lp.reshape(B, S)
    per_token_loss = per_loss.reshape(B, S)
    per_token_policy = per_pol.reshape(B, S)
    per_token_kl = per_kl.reshape(B, S)

    if padding_masks is None:
        padding_masks = jnp.ones((B, S), dtype=bool)
    mask = padding_masks.astype(jnp.float32)

    total_loss_sum = jnp.sum(per_token_loss * mask, axis=1)
    total_policy_sum = jnp.sum(per_token_policy * mask, axis=1)
    total_kl_sum = jnp.sum(per_token_kl * mask, axis=1)
    total_count = jnp.maximum(jnp.sum(mask, axis=1), 1e-9)

    loss = jnp.mean(total_loss_sum / total_count)
    policy_loss = jnp.mean(total_policy_sum / total_count)
    kl_loss = jnp.mean(total_kl_sum / total_count)
    ratios = jnp.float32(1.0)
    clipfrac = jnp.float32(0.0)
    return loss, policy_loss, kl_loss, ratios, clipfrac, pi_logprobs


def _reference(weight, outputs, targets, ref_logprobs, advantages,
               padding_masks, kl_coeff=0.1, ignore_index=-100):
    """Pure-JAX reference mirroring the PyTorch forward (bf16-rounded operands
    to match the kernel's MXU path, f32 accumulation)."""
    w = weight.astype(jnp.bfloat16).astype(jnp.float32)
    h = outputs.astype(jnp.bfloat16).astype(jnp.float32)
    logits = jnp.einsum("bse,ve->bsv", h, w,
                        precision=jax.lax.Precision.HIGHEST)
    lse = jax.nn.logsumexp(logits, axis=-1)
    tgt_logit = jnp.take_along_axis(
        logits, jnp.clip(targets, 0, None)[..., None], axis=-1)[..., 0]
    pi_lp = jnp.where(targets == ignore_index, 0.0, tgt_logit - lse)
    diff = ref_logprobs - pi_lp
    kl = jnp.exp(diff) - diff - 1.0
    pol = jnp.ones_like(pi_lp) * advantages[:, None]
    per_loss = -(pol - kl_coeff * kl)
    mask = padding_masks.astype(jnp.float32)
    cnt = jnp.maximum(mask.sum(1), 1e-9)
    loss = jnp.mean((per_loss * mask).sum(1) / cnt)
    policy_loss = jnp.mean((pol * mask).sum(1) / cnt)
    kl_loss = jnp.mean((kl * mask).sum(1) / cnt)
    return loss, policy_loss, kl_loss, pi_lp


if __name__ == "__main__":
    B, S, E, V = 2, 512, 128, 1024
    NUM_CHUNKS = 8       # -> TT = 128 tokens per chunk (lane-dense blocks)
    VOCAB_BLOCK = 256    # -> 4 vocab tiles, exercises the online logsumexp

    key = jax.random.PRNGKey(0)
    k_w, k_h, k_t, k_r, k_a, k_m = jax.random.split(key, 6)

    weight = jax.random.normal(k_w, (V, E), jnp.float32) * 0.05
    outputs = jax.random.normal(k_h, (B, S, E), jnp.float32) * 0.5
    targets = jax.random.randint(k_t, (B, S), 0, V, jnp.int32)
    # sprinkle a few ignore_index tokens
    targets = targets.at[:, -2:].set(-100)
    ref_logprobs = jax.random.normal(k_r, (B, S), jnp.float32) * 0.3 - 6.0
    advantages = jax.random.normal(k_a, (B,), jnp.float32)
    padding_masks = jax.random.uniform(k_m, (B, S)) > 0.1

    result = linear_grpo_loss(weight, outputs, targets, ref_logprobs,
                              advantages, padding_masks,
                              num_output_chunks=NUM_CHUNKS,
                              vocab_block=VOCAB_BLOCK)
    result = jax.block_until_ready(result)
    loss, policy_loss, kl_loss, ratios, clipfrac, pi_logprobs = result

    # sanity check vs pure-JAX reference
    ref_loss, ref_policy, ref_kl, ref_pi = _reference(
        weight, outputs, targets, ref_logprobs, advantages, padding_masks)
    assert pi_logprobs.shape == (B, S)
    assert jnp.allclose(pi_logprobs, ref_pi, atol=5e-3, rtol=5e-3), \
        float(jnp.max(jnp.abs(pi_logprobs - ref_pi)))
    assert jnp.allclose(loss, ref_loss, atol=5e-3, rtol=5e-3)
    assert jnp.allclose(policy_loss, ref_policy, atol=5e-3, rtol=5e-3)
    assert jnp.allclose(kl_loss, ref_kl, atol=5e-3, rtol=5e-3)
    assert float(ratios) == 1.0 and float(clipfrac) == 0.0

    print("KERNEL_OK")
</pallas_src>

<mosaic_0001>
module attributes {stable_mosaic.version = 11 : i64} {
  func.func @_grpo_kernel(%arg0: i32, %arg1: i32, %arg2: memref<256x128xbf16, #tpu.memory_space<vmem>>, %arg3: memref<128x128xbf16, #tpu.memory_space<vmem>>, %arg4: memref<1x1x128xi32, #tpu.memory_space<vmem>>, %arg5: memref<1x1x128xf32, #tpu.memory_space<vmem>>, %arg6: memref<1x1x128xf32, #tpu.memory_space<vmem>>, %arg7: memref<1x1x128xf32, #tpu.memory_space<vmem>>, %arg8: memref<1x1x128xf32, #tpu.memory_space<vmem>>, %arg9: memref<1x1x128xf32, #tpu.memory_space<vmem>>, %arg10: memref<1x1x128xf32, #tpu.memory_space<vmem>>, %arg11: memref<1x128xf32, #tpu.memory_space<vmem>>, %arg12: memref<1x128xf32, #tpu.memory_space<vmem>>, %arg13: memref<1x128xf32, #tpu.memory_space<vmem>>) attributes {dimension_semantics = [#tpu.dimension_semantics<parallel>, #tpu.dimension_semantics<arbitrary>], iteration_bounds = array<i64: 8, 4>, scalar_prefetch = 0 : i64, scratch_operands = 3 : i64, tpu.core_type = #tpu.core_type<tc>, window_params = [{transform_indices = @transform_0, window_bounds = array<i64: 256, 128>}, {transform_indices = @transform_1, window_bounds = array<i64: 128, 128>}, {transform_indices = @transform_2, window_bounds = array<i64: 1, 1, 128>}, {transform_indices = @transform_3, window_bounds = array<i64: 1, 1, 128>}, {transform_indices = @transform_4, window_bounds = array<i64: 1, 1, 128>}, {transform_indices = @transform_5, window_bounds = array<i64: 1, 1, 128>}, {transform_indices = @transform_6, window_bounds = array<i64: 1, 1, 128>}, {transform_indices = @transform_7, window_bounds = array<i64: 1, 1, 128>}, {transform_indices = @transform_8, window_bounds = array<i64: 1, 1, 128>}]} {
    %c0_i32 = arith.constant 0 : i32
    %0 = arith.cmpi eq, %arg1, %c0_i32 : i32
    %1 = arith.extui %0 : i1 to i32
    %c0_i32_0 = arith.constant 0 : i32
    %2 = arith.cmpi ne, %1, %c0_i32_0 : i32
    scf.if %2 {
      %cst_24 = arith.constant 0xFF800000 : f32
      %41 = vector.broadcast %cst_24 : f32 to vector<1x128xf32>
      %c0_25 = arith.constant 0 : index
      %c0_26 = arith.constant 0 : index
      %42 = vector.load %arg11[%c0_25, %c0_26] : memref<1x128xf32, #tpu.memory_space<vmem>>, vector<1x128xf32>
      tpu.vector_store %arg11[%c0_25, %c0_26], %41 {strides = array<i32>} : memref<1x128xf32, #tpu.memory_space<vmem>>, vector<1x128xf32>,
      %cst_27 = arith.constant 0.000000e+00 : f32
      %43 = vector.broadcast %cst_27 : f32 to vector<1x128xf32>
      %c0_28 = arith.constant 0 : index
      %c0_29 = arith.constant 0 : index
      %44 = vector.load %arg12[%c0_28, %c0_29] : memref<1x128xf32, #tpu.memory_space<vmem>>, vector<1x128xf32>
      tpu.vector_store %arg12[%c0_28, %c0_29], %43 {strides = array<i32>} : memref<1x128xf32, #tpu.memory_space<vmem>>, vector<1x128xf32>,
      %cst_30 = arith.constant 0.000000e+00 : f32
      %45 = vector.broadcast %cst_30 : f32 to vector<1x128xf32>
      %c0_31 = arith.constant 0 : index
      %c0_32 = arith.constant 0 : index
      %46 = vector.load %arg13[%c0_31, %c0_32] : memref<1x128xf32, #tpu.memory_space<vmem>>, vector<1x128xf32>
      tpu.vector_store %arg13[%c0_31, %c0_32], %45 {strides = array<i32>} : memref<1x128xf32, #tpu.memory_space<vmem>>, vector<1x128xf32>,
    } else {
    }
    %c0 = arith.constant 0 : index
    %c0_1 = arith.constant 0 : index
    %3 = vector.load %arg2[%c0, %c0_1] : memref<256x128xbf16, #tpu.memory_space<vmem>>, vector<256x128xbf16>
    %c0_2 = arith.constant 0 : index
    %c0_3 = arith.constant 0 : index
    %4 = vector.load %arg3[%c0_2, %c0_3] : memref<128x128xbf16, #tpu.memory_space<vmem>>, vector<128x128xbf16>
    %cst = arith.constant dense<0.000000e+00> : vector<256x128xf32>
    %5 = tpu.matmul %3, %4, %cst {dimension_numbers = #tpu.dot_dimension_numbers<[1], [1], [0], [0], [0, 0, 1, 0], [], []>} : vector<256x128xbf16>, vector<128x128xbf16>, vector<256x128xf32> -> vector<256x128xf32>
    %c0_4 = arith.constant 0 : index
    %c0_5 = arith.constant 0 : index
    %c0_6 = arith.constant 0 : index
    %6 = vector.load %arg4[%c0_4, %c0_5, %c0_6] : memref<1x1x128xi32, #tpu.memory_space<vmem>>, vector<1x1x128xi32>
    %7 = vector.shape_cast %6 : vector<1x1x128xi32> to vector<1x128xi32>
    %c256_i32 = arith.constant 256 : i32
    %8 = arith.muli %arg1, %c256_i32 : i32
    %9 = tpu.iota {dimensions = array<i32: 0>} : vector<256x1xi32>
    %10 = vector.broadcast %8 : i32 to vector<256x1xi32>
    %11 = arith.addi %10, %9 : vector<256x1xi32>
    %cst_7 = arith.constant dense<0xFF800000> : vector<128xf32>
    %12 = vector.multi_reduction <maximumf>, %5, %cst_7 [0] : vector<256x128xf32> to vector<128xf32>
    %13 = vector.shape_cast %12 : vector<128xf32> to vector<1x128xf32>
    %c0_8 = arith.constant 0 : index
    %c0_9 = arith.constant 0 : index
    %14 = vector.load %arg11[%c0_8, %c0_9] : memref<1x128xf32, #tpu.memory_space<vmem>>, vector<1x128xf32>
    %15 = arith.maximumf %14, %13 : vector<1x128xf32>
    %c0_10 = arith.constant 0 : index
    %c0_11 = arith.constant 0 : index
    %16 = vector.load %arg12[%c0_10, %c0_11] : memref<1x128xf32, #tpu.memory_space<vmem>>, vector<1x128xf32>
    %17 = arith.subf %14, %15 : vector<1x128xf32>
    %18 = math.exp %17 : vector<1x128xf32>
    %19 = arith.mulf %16, %18 : vector<1x128xf32>
    %20 = vector.broadcast %15 : vector<1x128xf32> to vector<256x128xf32>
    %21 = arith.subf %5, %20 : vector<256x128xf32>
    %22 = math.exp %21 : vector<256x128xf32>
    %cst_12 = arith.constant dense<0.000000e+00> : vector<128xf32>
    %23 = vector.multi_reduction <add>, %22, %cst_12 [0] : vector<256x128xf32> to vector<128xf32>
    %24 = vector.shape_cast %23 : vector<128xf32> to vector<1x128xf32>
    %25 = arith.addf %19, %24 : vector<1x128xf32>
    %c0_13 = arith.constant 0 : index
    %c0_14 = arith.constant 0 : index
    %26 = vector.load %arg12[%c0_13, %c0_14] : memref<1x128xf32, #tpu.memory_space<vmem>>, vector<1x128xf32>
    tpu.vector_store %arg12[%c0_13, %c0_14], %25 {strides = array<i32>} : memref<1x128xf32, #tpu.memory_space<vmem>>, vector<1x128xf32>,
    %c0_15 = arith.constant 0 : index
    %c0_16 = arith.constant 0 : index
    %27 = vector.load %arg13[%c0_15, %c0_16] : memref<1x128xf32, #tpu.memory_space<vmem>>, vector<1x128xf32>
    %28 = vector.broadcast %11 : vector<256x1xi32> to vector<256x128xi32>
    %29 = vector.broadcast %7 : vector<1x128xi32> to vector<256x128xi32>
    %30 = arith.cmpi eq, %28, %29 : vector<256x128xi32>
    %cst_17 = arith.constant 0.000000e+00 : f32
    %31 = vector.broadcast %cst_17 : f32 to vector<256x128xf32>
    %32 = arith.select %30, %5, %31 : vector<256x128xi1>, vector<256x128xf32>
    %cst_18 = arith.constant dense<0.000000e+00> : vector<128xf32>
    %33 = vector.multi_reduction <add>, %32, %cst_18 [0] : vector<256x128xf32> to vector<128xf32>
    %34 = vector.shape_cast %33 : vector<128xf32> to vector<1x128xf32>
    %35 = arith.addf %27, %34 : vector<1x128xf32>
    %c0_19 = arith.constant 0 : index
    %c0_20 = arith.constant 0 : index
    %36 = vector.load %arg13[%c0_19, %c0_20] : memref<1x128xf32, #tpu.memory_space<vmem>>, vector<1x128xf32>
    tpu.vector_store %arg13[%c0_19, %c0_20], %35 {strides = array<i32>} : memref<1x128xf32, #tpu.memory_space<vmem>>, vector<1x128xf32>,
    %c0_21 = arith.constant 0 : index
    %c0_22 = arith.constant 0 : index
    %37 = vector.load %arg11[%c0_21, %c0_22] : memref<1x128xf32, #tpu.memory_space<vmem>>, vector<1x128xf32>
    tpu.vector_store %arg11[%c0_21, %c0_22], %15 {strides = array<i32>} : memref<1x128xf32, #tpu.memory_space<vmem>>, vector<1x128xf32>,
    %c3_i32 = arith.constant 3 : i32
    %38 = arith.cmpi eq, %arg1, %c3_i32 : i32
    %39 = arith.extui %38 : i1 to i32
    %c0_i32_23 = arith.constant 0 : i32
    %40 = arith.cmpi ne, %39, %c0_i32_23 : i32
    scf.if %40 {
      %c0_24 = arith.constant 0 : index
      %c0_25 = arith.constant 0 : index
      %41 = vector.load %arg11[%c0_24, %c0_25] : memref<1x128xf32, #tpu.memory_space<vmem>>, vector<1x128xf32>
      %c0_26 = arith.constant 0 : index
      %c0_27 = arith.constant 0 : index
      %42 = vector.load %arg12[%c0_26, %c0_27] : memref<1x128xf32, #tpu.memory_space<vmem>>, vector<1x128xf32>
      %43 = math.log %42 : vector<1x128xf32>
      %44 = arith.addf %41, %43 : vector<1x128xf32>
      %c0_28 = arith.constant 0 : index
      %c0_29 = arith.constant 0 : index
      %45 = vector.load %arg13[%c0_28, %c0_29] : memref<1x128xf32, #tpu.memory_space<vmem>>, vector<1x128xf32>
      %46 = arith.subf %45, %44 : vector<1x128xf32>
      %c-100_i32 = arith.constant -100 : i32
      %47 = vector.broadcast %c-100_i32 : i32 to vector<1x128xi32>
      %48 = arith.cmpi eq, %7, %47 : vector<1x128xi32>
      %cst_30 = arith.constant 0.000000e+00 : f32
      %49 = vector.broadcast %cst_30 : f32 to vector<1x128xf32>
      %50 = arith.select %48, %49, %46 : vector<1x128xi1>, vector<1x128xf32>
      %c0_31 = arith.constant 0 : index
      %c0_32 = arith.constant 0 : index
      %c0_33 = arith.constant 0 : index
      %51 = vector.load %arg5[%c0_31, %c0_32, %c0_33] : memref<1x1x128xf32, #tpu.memory_space<vmem>>, vector<1x1x128xf32>
      %52 = vector.shape_cast %51 : vector<1x1x128xf32> to vector<1x128xf32>
      %c0_34 = arith.constant 0 : index
      %c0_35 = arith.constant 0 : index
      %c0_36 = arith.constant 0 : index
      %53 = vector.load %arg6[%c0_34, %c0_35, %c0_36] : memref<1x1x128xf32, #tpu.memory_space<vmem>>, vector<1x1x128xf32>
      %54 = vector.shape_cast %53 : vector<1x1x128xf32> to vector<1x128xf32>
      %55 = arith.subf %52, %50 : vector<1x128xf32>
      %56 = math.exp %55 : vector<1x128xf32>
      %57 = arith.subf %56, %55 : vector<1x128xf32>
      %cst_37 = arith.constant 1.000000e+00 : f32
      %58 = vector.broadcast %cst_37 : f32 to vector<1x128xf32>
      %59 = arith.subf %57, %58 : vector<1x128xf32>
      %60 = arith.subf %50, %50 : vector<1x128xf32>
      %61 = math.exp %60 : vector<1x128xf32>
      %62 = arith.mulf %61, %54 : vector<1x128xf32>
      %cst_38 = arith.constant 1.000000e-01 : f32
      %63 = vector.broadcast %cst_38 : f32 to vector<1x128xf32>
      %64 = arith.mulf %63, %59 : vector<1x128xf32>
      %65 = arith.subf %62, %64 : vector<1x128xf32>
      %cst_39 = arith.constant 0.000000e+00 : f32
      %66 = vector.broadcast %cst_39 : f32 to vector<1x128xf32>
      %67 = arith.subf %66, %65 : vector<1x128xf32>
      %c0_40 = arith.constant 0 : index
      %c0_41 = arith.constant 0 : index
      %c0_42 = arith.constant 0 : index
      %68 = vector.load %arg7[%c0_40, %c0_41, %c0_42] : memref<1x1x128xf32, #tpu.memory_space<vmem>>, vector<1x1x128xf32>
      %69 = vector.shape_cast %68 : vector<1x1x128xf32> to vector<1x128xf32>
      %70 = vector.shape_cast %50 : vector<1x128xf32> to vector<1x1x128xf32>
      tpu.vector_store %arg7[%c0_40, %c0_41, %c0_42], %70 {strides = array<i32>} : memref<1x1x128xf32, #tpu.memory_space<vmem>>, vector<1x1x128xf32>,
      %c0_43 = arith.constant 0 : index
      %c0_44 = arith.constant 0 : index
      %c0_45 = arith.constant 0 : index
      %71 = vector.load %arg8[%c0_43, %c0_44, %c0_45] : memref<1x1x128xf32, #tpu.memory_space<vmem>>, vector<1x1x128xf32>
      %72 = vector.shape_cast %71 : vector<1x1x128xf32> to vector<1x128xf32>
      %73 = vector.shape_cast %67 : vector<1x128xf32> to vector<1x1x128xf32>
      tpu.vector_store %arg8[%c0_43, %c0_44, %c0_45], %73 {strides = array<i32>} : memref<1x1x128xf32, #tpu.memory_space<vmem>>, vector<1x1x128xf32>,
      %c0_46 = arith.constant 0 : index
      %c0_47 = arith.constant 0 : index
      %c0_48 = arith.constant 0 : index
      %74 = vector.load %arg9[%c0_46, %c0_47, %c0_48] : memref<1x1x128xf32, #tpu.memory_space<vmem>>, vector<1x1x128xf32>
      %75 = vector.shape_cast %74 : vector<1x1x128xf32> to vector<1x128xf32>
      %76 = vector.shape_cast %62 : vector<1x128xf32> to vector<1x1x128xf32>
      tpu.vector_store %arg9[%c0_46, %c0_47, %c0_48], %76 {strides = array<i32>} : memref<1x1x128xf32, #tpu.memory_space<vmem>>, vector<1x1x128xf32>,
      %c0_49 = arith.constant 0 : index
      %c0_50 = arith.constant 0 : index
      %c0_51 = arith.constant 0 : index
      %77 = vector.load %arg10[%c0_49, %c0_50, %c0_51] : memref<1x1x128xf32, #tpu.memory_space<vmem>>, vector<1x1x128xf32>
      %78 = vector.shape_cast %77 : vector<1x1x128xf32> to vector<1x128xf32>
      %79 = vector.shape_cast %59 : vector<1x128xf32> to vector<1x1x128xf32>
      tpu.vector_store %arg10[%c0_49, %c0_50, %c0_51], %79 {strides = array<i32>} : memref<1x1x128xf32, #tpu.memory_space<vmem>>, vector<1x1x128xf32>,
    } else {
    }
    return
  }
  func.func @transform_0(%arg0: i32, %arg1: i32) -> (i32, i32) {
    %c0_i32 = arith.constant 0 : i32
    %c0_i32_0 = arith.constant 0 : i32
    return %arg1, %c0_i32 : i32, i32
  }
  func.func @transform_1(%arg0: i32, %arg1: i32) -> (i32, i32) {
    %c0_i32 = arith.constant 0 : i32
    %c0_i32_0 = arith.constant 0 : i32
    return %arg0, %c0_i32 : i32, i32
  }
  func.func @transform_2(%arg0: i32, %arg1: i32) -> (i32, i32, i32) {
    %c0_i32 = arith.constant 0 : i32
    %c0_i32_0 = arith.constant 0 : i32
    %c0_i32_1 = arith.constant 0 : i32
    return %arg0, %c0_i32, %c0_i32_0 : i32, i32, i32
  }
  func.func @transform_3(%arg0: i32, %arg1: i32) -> (i32, i32, i32) {
    %c0_i32 = arith.constant 0 : i32
    %c0_i32_0 = arith.constant 0 : i32
    %c0_i32_1 = arith.constant 0 : i32
    return %arg0, %c0_i32, %c0_i32_0 : i32, i32, i32
  }
  func.func @transform_4(%arg0: i32, %arg1: i32) -> (i32, i32, i32) {
    %c0_i32 = arith.constant 0 : i32
    %c0_i32_0 = arith.constant 0 : i32
    %c0_i32_1 = arith.constant 0 : i32
    return %arg0, %c0_i32, %c0_i32_0 : i32, i32, i32
  }
  func.func @transform_5(%arg0: i32, %arg1: i32) -> (i32, i32, i32) {
    %c0_i32 = arith.constant 0 : i32
    %c0_i32_0 = arith.constant 0 : i32
    %c0_i32_1 = arith.constant 0 : i32
    return %arg0, %c0_i32, %c0_i32_0 : i32, i32, i32
  }
  func.func @transform_6(%arg0: i32, %arg1: i32) -> (i32, i32, i32) {
    %c0_i32 = arith.constant 0 : i32
    %c0_i32_0 = arith.constant 0 : i32
    %c0_i32_1 = arith.constant 0 : i32
    return %arg0, %c0_i32, %c0_i32_0 : i32, i32, i32
  }
  func.func @transform_7(%arg0: i32, %arg1: i32) -> (i32, i32, i32) {
    %c0_i32 = arith.constant 0 : i32
    %c0_i32_0 = arith.constant 0 : i32
    %c0_i32_1 = arith.constant 0 : i32
    return %arg0, %c0_i32, %c0_i32_0 : i32, i32, i32
  }
  func.func @transform_8(%arg0: i32, %arg1: i32) -> (i32, i32, i32) {
    %c0_i32 = arith.constant 0 : i32
    %c0_i32_0 = arith.constant 0 : i32
    %c0_i32_1 = arith.constant 0 : i32
    return %arg0, %c0_i32, %c0_i32_0 : i32, i32, i32
  }
}

</mosaic_0001>

<bundles_post_ra>
// kernel: tpu_custom_call.1
= control target key start
LH: loop header
LB: loop body
LE: loop exit
PB: predicated region body
PF: predicated region fallthrough
CT: control target
= control target key end

     0   :  { %s3108_s0 = inlined_call_operand.hbm [shape: bf16[1024,128], index: 0, kind: input, shape index: {}]   ;;  %s3109_s1 = inlined_call_operand.hbm [shape: bf16[1024,128], index: 1, kind: input, shape index: {}]   ;;  %s3110_s2 = inlined_call_operand.hbm [shape: s32[8,1,128], index: 2, kind: input, shape index: {}]   ;;  %s3111_s3 = inlined_call_operand.hbm [shape: f32[8,1,128], index: 3, kind: input, shape index: {}]   ;;  %s3112_s4 = inlined_call_operand.hbm [shape: f32[8,1,128], index: 4, kind: input, shape index: {}]   ;;  %s3113_s5 = inlined_call_operand.hbm [shape: f32[8,1,128], index: 5, kind: output, shape index: {0}]   ;;  %s3114_s6 = inlined_call_operand.hbm [shape: f32[8,1,128], index: 6, kind: output, shape index: {1}]   ;;  %s3115_s7 = inlined_call_operand.hbm [shape: f32[8,1,128], index: 7, kind: output, shape index: {2}]   ;;  %s3116_s8 = inlined_call_operand.hbm [shape: f32[8,1,128], index: 8, kind: output, shape index: {3}]  }
   0x1   :  { %3140 = sst [smem:[#allocation38_spill]] %s3109_s1 }
   0x2   :  { %3141 = sst [smem:[#allocation39_spill]] %s3111_s3 }
   0x3   :  { %3142 = sst [smem:[#allocation40_spill]] %s3113_s5 }
   0x4   :  { %3143 = sst [smem:[#allocation41_spill]] %s3114_s6 }
   0x5   :  { %3144 = sst [smem:[#allocation42_spill]] %s3115_s7 }
   0x6   :  { %3145 = sst [smem:[#allocation43_spill]] %s3116_s8 }
   0x7   :  { %14 = vsyncpa [#allocation6], 0 }
   0x8   :  { %16 = vsyncpa [#allocation6 + $0x1], 0 }
   0x9   :  { %17 = vsyncpa [#allocation9], 0 }
   0xa   :  { %19 = vsyncpa [#allocation9 + $0x1], 0 }
   0xb   :  { %20 = vsyncpa [#allocation12], 0 }
   0xc   :  { %22 = vsyncpa [#allocation12 + $0x1], 0 }
   0xd   :  { %23 = vsyncpa [#allocation7], 0 }
   0xe   :  { %25 = vsyncpa [#allocation7 + $0x1], 0 }
   0xf   :  { %26 = vsyncpa [#allocation16], 0 }
  0x10   :  { %28 = vsyncpa [#allocation16 + $0x1], 0 }
  0x11   :  { %29 = vsyncpa [#allocation19], 0 }
  0x12   :  { %31 = vsyncpa [#allocation19 + $0x1], 0  ;;  %s2342_s27 = smov 0   ;;  %s2344_s28 = smov 0  }
  0x13   :  { %s2346_s29 = smov 0   ;;  %s2348_s30 = smov 0  }
  0x14   :  { %s2350_s9 = smov 0   ;;  %s2352_s10 = smov 0  }
  0x15   :  { %s2354_s11 = smov 0   ;;  %s2356_s12 = smov 0  }
  0x16   :  { %s2358_s13 = smov 0   ;;  %s2360_s14 = smov 0  }
  0x17   :  { %s2362_s15 = smov 0  }
  0x18 LB: > { %3146 = sst [smem:[#allocation26_spill]] %s2258_s9  ;;  %s2398_s16 = sadd.s32 4294967295, %s2282_s15   ;;  %s2282_s15 = sphi %s2362_s15, %s37_s15   ;;  %s2278_s14 = sphi %s2360_s14, %s3197_s14   ;;  %s2274_s13 = sphi %s2358_s13, %s3196_s13   ;;  %s2270_s12 = sphi %s2356_s12, %s3195_s12   ;;  %s2266_s11 = sphi %s2354_s11, %s3194_s11   ;;  %s2262_s10 = sphi %s2352_s10, %s3193_s10   ;;  %s2258_s9 = sphi %s2350_s9, %s3192_s9   ;;  %s2254_s30 = sphi %s2348_s30, %s3191_s30   ;;  %s2250_s29 = sphi %s2346_s29, %s3200_s29   ;;  %s2246_s28 = sphi %s2344_s28, %s3199_s28   ;;  %s2242_s27 = sphi %s2342_s27, %s3198_s27  }
  0x19   : > { %3147 = sst [smem:[#allocation27_spill]] %s2262_s10  ;;  %s3117_s17 = sadd.s32 4294967294, %s2282_s15  }
  0x1a   : > { %3148 = sst [smem:[#allocation28_spill]] %s2266_s11  ;;  %p64_p0 = scmp.eq.s32.totalorder %s2282_s15, 0 }
  0x1b   : > { %3149 = sst [smem:[#allocation29_spill]] %s2270_s12  ;;  %p89_p1 = scmp.ne.s32.totalorder %s2250_s29, %s2246_s28 }
  0x1c   : > { %3150 = sst [smem:[#allocation30_spill]] %s2274_s13  ;;  %p3123_p2 = scmp.ne.s32.totalorder %s2246_s28, %s2242_s27 }
  0x1d   : > { %3151 = sst [smem:[#allocation31_spill]] %s2278_s14  ;;  %p197_p3 = scmp.eq.s32.totalorder %s2398_s16, 31 }
  0x1e   : > { %3152 = sst [smem:[#allocation32_spill]] %s2398_s16  ;;  %p203_p4 = scmp.eq.s32.totalorder %s3117_s17, 31 }
  0x1f   : > { %p91_p5 = por %p89_p1, %p64_p0  ;;  %p2412_p6 = por %p197_p3, %p89_p1 }
  0x20   : > { %p2419_p7 = por %p203_p4, %p3123_p2  ;;  %p3122_p8 = scmp.lt.s32.totalorder %s2282_s15, 32 }
  0x21   : > { %s3153_s19 = scalar_select %p2412_p6, 1, 0 }
  0x22   : > { %s3155_s20 = scalar_select %p2419_p7, 1, 0 }
  0x23   : > { %3154 = sst [smem:[#allocation33_spill]] %s3153_s19  ;;  %s3124_s21 = sand.u32 1, %s2282_s15  }
  0x24   : > { %3156 = sst [smem:[#allocation34_spill]] %s3155_s20  ;;  %s2426_s22 = sand.u32 1, %s2250_s29  }
  0x25   : > { %s1558_s23 = sshll.u32 %s2426_s22, 6  ;;  %s1602_s24 = sshll.u32 %s2278_s14, 10 }
  0x26   : > { %s3157_s1 = sld [smem:[#allocation38_spill]]  ;;  %s326_s18 = scalar_lea.vmem [#allocation8], %s1558_s23 }
  0x27   : > { %s333_s8 = sshll.u32 %s326_s18, 4  ;;  %p2435_p9 = pnand %p3122_p8, %p91_p5  ;;  %s334_s8 = int_to_ptr.vmem [resolvable:$true] %s333_s8 }
  0x28   : > { %p1564_p10 = scmp.ge.s32.totalorder %s2282_s15, 1  ;;  %p392_p11 = scmp.lt.s32.totalorder %s2282_s15, 33 }
  0x29   : > { %s2443_s20 = scalar_lea.sflag [#allocation9], %s3124_s21  ;;  %p3138_p12 = pneg %p2435_p9 }
  0x2a   : > { %s1941_s5 = scalar_lea.vmem %s334_s8, 1024  ;;  %s2284_s18 = smov [#allocation8]  }
  0x2b   : > { %p1942_p13 = scmp.ne.s32.totalorder %s334_s8, %s1941_s5  ;;  %s1946_s23 = sshll.u32 %s2284_s18, 4  ;;  %s1947_s23 = int_to_ptr.vmem [resolvable:$false] %s1946_s23 }
  0x2c   : > { %s332_s17 = scalar_lea.hbm %s3157_s1, %s1602_s24  ;;  %s1948_s24 = scalar_lea.vmem %s1947_s23, 2048 }
  0x2d   : > { %p1944_p1 = pnand %p1942_p13, %p3138_p12  ;;  %p1949_p4 = scmp.lt.s32.totalorder %s334_s8, %s1947_s23 }
  0x2e   : > { %p1950_p5 = scmp.lt.s32.totalorder %s1948_s24, %s1941_s5 }
  0x2f   : > { %p1945_p3 = pneg %p1944_p1 }
  0x30   : > { %p1951_p8 = por %p1950_p5, %p1949_p4 }
  0x32   : > { %p1952_p2 = pnand %p1951_p8, %p1945_p3 }
  0x34   : > { %1955 = shalt.err (!%p1952_p2)
}
  0x35   : > { %s3128_s25 = smov 64   ;;  %s3129_s26 = smov 4  }
  0x36   : > { %1715 = dma.hbm_to_vmem [thread:$0]  (!%p2435_p9), %s332_s17, 1024, %s334_s8, %s2443_s20, %s3128_s25, %s3128_s25, %s3129_s26  }
  0x37   : > { %p2460_p13 = pnand %p1564_p10, %p392_p11  ;;  %s2465_s18 = sshll.u32 %s2278_s14, 4 }
  0x38   : > { %s3160_s3 = sld [smem:[#allocation39_spill]]  ;;  %s363_s1 = scalar_lea.vmem [#allocation11], %s2426_s22 }
  0x39   : > { %s370_s6 = sshll.u32 %s363_s1, 4  ;;  %s3161_s19 = sand.u32 1, %s2282_s15   ;;  %s371_s6 = int_to_ptr.vmem [resolvable:$true] %s370_s6 }
  0x3a   : > { %s2474_s12 = scalar_lea.sflag [#allocation12], %s3161_s19  ;;  %s1969_s8 = scalar_lea.vmem %s371_s6, 16 }
  0x3b   : > { %p1970_p2 = scmp.ne.s32.totalorder %s371_s6, %s1969_s8  ;;  %s2287_s17 = smov [#allocation11]  }
  0x3c   : > { %s1974_s25 = sshll.u32 %s2287_s17, 4  ;;  %s1975_s25 = int_to_ptr.vmem [resolvable:$false] %s1974_s25 }
  0x3d   : > { %p1972_p8 = pnand %p1970_p2, %p3138_p12  ;;  %s1976_s26 = scalar_lea.vmem %s1975_s25, 32 }
  0x3e   : > { %s368_s21 = scalar_lea.hbm %s3160_s3, %s2465_s18  ;;  %p1977_p11 = scmp.lt.s32.totalorder %s371_s6, %s1975_s25 }
  0x3f   : > { %p1973_p10 = pneg %p1972_p8  ;;  %p1978_p1 = scmp.lt.s32.totalorder %s1976_s26, %s1969_s8 }
  0x41   : > { %p1979_p3 = por %p1978_p1, %p1977_p11 }
  0x43   : > { %p1980_p4 = pnand %p1979_p3, %p1973_p10 }
  0x45   : > { %1983 = shalt.err (!%p1980_p4)
}
  0x46   : > { %1721 = dma.hbm_to_vmem [thread:$0]  (!%p2435_p9), %s368_s21, 16, %s371_s6, %s2474_s12  }
  0x47   : > { %s46_s1 = sadd.s32 1, %s2274_s13  ;;  %s49_s19 = sadd.s32 1, %s2278_s14 }
  0x48   : > { %p47_p5 = scmp.ge.s32.totalorder %s46_s1, 4  ;;  %s56_s25 = sadd.s32 1, %s2262_s10 }
  0x49   : > { %p63_p2 = scmp.ne.s32.totalorder %s2262_s10, %s2258_s9  ;;  %p69_p1 = scmp.ne.s32.totalorder %s2258_s9, %s2254_s30 }
  0x4a   : > { %s3202_s1 = smov (%p47_p5, %s46_s1), 0  ;;  %s3204_s19 = smov (!%p47_p5, %s49_s19), %s2278_s14 }
  0x4b   : > { %3162 = sst [smem:[#allocation35_spill]] %s3202_s1  ;;  %s53_s26 = ssub.s32 %s2274_s13, %s3202_s1 }
  0x4c   : > { %p2494_p8 = por %p64_p0, %p63_p2  ;;  %p51_p10 = scmp.ge.s32.totalorder %s3204_s19, 8 }
  0x4d   : > { %p54_p11 = scmp.eq.s32.totalorder %s53_s26, 0  ;;  %p70_p3 = scmp.eq.s32.totalorder %s2398_s16, 0 }
  0x4e   : > { %s3206_s19 = smov (%p51_p10, %s3204_s19), 0  ;;  %p3167_p5 = scmp.ne.s32.totalorder %s2246_s28, %s2242_s27 }
  0x4f   : > { %3164 = sst [smem:[#allocation36_spill]] %s3206_s19  ;;  %p2506_p4 = por %p70_p3, %p69_p1 }
  0x50   : > { %s2504_s21 = scalar_select %p54_p11, %s2262_s10, %s56_s25  }
  0x51   : > { %s79_s24 = ssub.s32 %s2278_s14, %s3206_s19  ;;  %p2515_p2 = por %p3167_p5, %p70_p3 }
  0x52   : > { %3165 = sst [smem:[#allocation37_spill]] %s2504_s21  ;;  %p80_p0 = scmp.eq.s32.totalorder %s79_s24, 0 }
  0x53   : > { %s301_s17 = sand.u32 1, %s2262_s10   ;;  %s1601_s30 = sshll.u32 %s2274_s13, 11 }
  0x54   : > { %s3169_s26 = sadd.s32 1, %s2250_s29  ;;  %s1555_s1 = sshll.u32 %s301_s17, 7 }
  0x55   : > { %s2524_s3 = scalar_select %p80_p0, %s2250_s29, %s3169_s26  }
  0x56   : > { %s311_s21 = scalar_lea.hbm %s3108_s0, %s1601_s30  ;;  %s305_s16 = scalar_lea.vmem [#allocation5], %s1555_s1 }
  0x57   : > { %s312_s9 = sshll.u32 %s305_s16, 4  ;;  %p3170_p10 = scmp.lt.s32.totalorder %s2282_s15, 32  ;;  %s313_s9 = int_to_ptr.vmem [resolvable:$true] %s312_s9 }
  0x58   : > { %s351_s26 = scalar_lea.hbm %s3110_s2, %s2465_s18  ;;  %s302_s13 = scalar_lea.sflag [#allocation6], %s301_s17 }
  0x59   : > { %p2533_p11 = pnand %p3170_p10, %p2494_p8  ;;  %s1997_s10 = scalar_lea.vmem %s313_s9, 2048 }
  0x5a   : > { %p1998_p3 = scmp.ne.s32.totalorder %s313_s9, %s1997_s10  ;;  %s2288_s11 = smov [#allocation5]  }
  0x5b   : > { %p1986_p1 = pneg %p2533_p11  ;;  %s2002_s16 = sshll.u32 %s2288_s11, 4  ;;  %s2003_s16 = int_to_ptr.vmem [resolvable:$false] %s2002_s16 }
  0x5c   : > { %s2004_s1 = scalar_lea.vmem %s2003_s16, 4096  ;;  %p2005_p8 = scmp.lt.s32.totalorder %s313_s9, %s2003_s16 }
  0x5d   : > { %p2000_p0 = pnand %p1998_p3, %p1986_p1  ;;  %p2006_p10 = scmp.lt.s32.totalorder %s2004_s1, %s1997_s10 }
  0x5f   : > { %p2001_p5 = pneg %p2000_p0  ;;  %p2007_p12 = por %p2006_p10, %p2005_p8 }
  0x61   : > { %p2008_p7 = pnand %p2007_p12, %p2001_p5 }
  0x63   : > { %2011 = shalt.err (!%p2008_p7)
}
  0x64   : > { %s3172_s14 = smov 4   ;;  %s3173_s19 = smov 64  }
  0x65   : > { %1712 = dma.hbm_to_vmem [thread:$0]  (!%p2533_p11), %s311_s21, 2048, %s313_s9, %s302_s13, %s3173_s19, %s3173_s19, %s3172_s14  }
  0x66   : > { %s346_s6 = scalar_lea.vmem [#allocation10], %s2426_s22  ;;  %s385_s11 = scalar_lea.hbm %s3112_s4, %s2465_s18 }
  0x67   : > { %s353_s17 = sshll.u32 %s346_s6, 4  ;;  %p3174_p7 = pneg %p2435_p9  ;;  %s354_s17 = int_to_ptr.vmem [resolvable:$true] %s353_s17 }
  0x68   : > { %s2025_s10 = scalar_lea.vmem %s354_s17, 16  ;;  %s2289_s24 = smov [#allocation10]  }
  0x69   : > { %p2026_p1 = scmp.ne.s32.totalorder %s354_s17, %s2025_s10  ;;  %s2030_s16 = sshll.u32 %s2289_s24, 4  ;;  %s2031_s16 = int_to_ptr.vmem [resolvable:$false] %s2030_s16 }
  0x6a   : > { %s2032_s1 = scalar_lea.vmem %s2031_s16, 32  ;;  %p2033_p0 = scmp.lt.s32.totalorder %s354_s17, %s2031_s16 }
  0x6b   : > { %p2028_p12 = pnand %p2026_p1, %p3174_p7  ;;  %p2034_p5 = scmp.lt.s32.totalorder %s2032_s1, %s2025_s10 }
  0x6d   : > { %p2029_p3 = pneg %p2028_p12  ;;  %p2035_p11 = por %p2034_p5, %p2033_p0 }
  0x6f   : > { %p2036_p8 = pnand %p2035_p11, %p2029_p3 }
  0x71   : > { %2039 = shalt.err (!%p2036_p8)
}
  0x72   : > { %1718 = dma.hbm_to_vmem [thread:$0]  (!%p2435_p9), %s351_s26, 16, %s354_s17, %s2443_s20  }
  0x73   : > { %s380_s21 = scalar_lea.vmem [#allocation13], %s2426_s22  ;;  %p3175_p1 = pmov %p3174_p7 }
  0x74   : > { %s387_s14 = sshll.u32 %s380_s21, 4  ;;  %s2290_s6 = smov [#allocation13]   ;;  %s388_s14 = int_to_ptr.vmem [resolvable:$true] %s387_s14 }
  0x75   : > { %s2053_s19 = scalar_lea.vmem %s388_s14, 16  ;;  %s2058_s30 = sshll.u32 %s2290_s6, 4  ;;  %s2059_s30 = int_to_ptr.vmem [resolvable:$false] %s2058_s30 }
  0x76   : > { %p2054_p10 = scmp.ne.s32.totalorder %s388_s14, %s2053_s19  ;;  %s2060_s25 = scalar_lea.vmem %s2059_s30, 32 }
  0x77   : > { %p2061_p3 = scmp.lt.s32.totalorder %s388_s14, %s2059_s30  ;;  %p2062_p0 = scmp.lt.s32.totalorder %s2060_s25, %s2053_s19 }
  0x78   : > { %p2056_p7 = pnand %p2054_p10, %p3175_p1 }
  0x79   : > { %p2063_p5 = por %p2062_p0, %p2061_p3 }
  0x7a   : > { %p2057_p12 = pneg %p2056_p7 }
  0x7c   : > { %p2064_p11 = pnand %p2063_p5, %p2057_p12 }
  0x7e   : > { %2067 = shalt.err (!%p2064_p11)
}
  0x7f   : > { %1724 = dma.hbm_to_vmem [thread:$0]  (!%p2435_p9), %s385_s11, 16, %s388_s14, %s2474_s12  }
  0x80   : > { %396 = sbr.rel (%p2460_p13) target bundleno = 733 (0x2dd), region = 40  ;;  %s3176_s26 = sld [smem:[#allocation26_spill]] (!%p2460_p13) }
  0x86   : > { %s398_s17 = sand.u32 1, %s3176_s26  }
  0x87   : > { %s1565_s10 = sshll.u32 %s398_s17, 7  ;;  %s399_s24 = scalar_lea.sflag [#allocation6], %s398_s17 }
  0x88   : > { %s2579_s16 = scalar_lea.vmem [#allocation5], %s1565_s10 }
  0x89   : > { %2217 = dma.done.wait (%p2506_p4), %s399_s24, 2048  }
  0x8a   : > { %2219 = vsyncadd (%p2506_p4), %s399_s24, 4294965248  ;;  %s3177_s7 = sld [smem:[#allocation32_spill]]  ;;  %s2589_s12 = sand.u32 1, %s2246_s28  }
  0x8b   : > { %s1566_s5 = sshll.u32 %s2589_s12, 6 }
  0x8c   : > { %s2593_s1 = scalar_lea.vmem [#allocation8], %s1566_s5 }
  0x90   : > { %s2586_s18 = sand.u32 1, %s3177_s7  }
  0x91   : > { %s408_s11 = scalar_lea.sflag [#allocation9], %s2586_s18 }
  0x92   : > { %2221 = dma.done.wait (%p2515_p2), %s408_s11, 1040  }
  0x93   : > { %2223 = vsyncadd (%p2515_p2), %s408_s11, 4294966256  ;;  %s419_s23 = scalar_lea.vmem [#allocation10], %s2589_s12  ;;  %s425_s9 = scalar_lea.sflag [#allocation12], %s2586_s18 }
  0x94   : > { %s427_s13 = scalar_lea.vmem [#allocation11], %s2589_s12 }
  0x95   : > { %2225 = dma.done.wait (%p2515_p2), %s425_s9, 32  }
  0x96   : > { %2227 = vsyncadd (%p2515_p2), %s425_s9, 4294967264  ;;  %s435_s21 = scalar_lea.vmem [#allocation13], %s2589_s12  ;;  %s477_s14 = scalar_lea.vmem [#allocation14], %s2589_s12 }
  0x97   : > { %s483_s19 = scalar_lea.vmem [#allocation15], %s2589_s12  ;;  %s489_s6 = scalar_lea.vmem [#allocation17], %s2589_s12 }
  0x98   : > { %s3139_s30 = scalar_lea.vmem [#allocation18], %s2589_s12  ;;  %s3178_s25 = sld [smem:[#allocation28_spill]] }
  0x9e   : > { %p1567_p9 = scmp.ne.s32.totalorder %s3178_s25, 0 }
  0xa0   : > { %502 = sbr.rel (%p1567_p9) target bundleno = 168 (0xa8), region = 64 }
  0xa5   : > { %v2291_v0 = vmov -inf   ;;  %v2292_v1 = vmov 0.0  }
  0xa6   : > { %503 = vst [vmem:[#allocation2] sm:$0x1] %v2291_v0  ;;  %504 = vst [vmem:[#allocation3] sm:$0x1] %v2292_v1 }
  0xa7   : > { %505 = vst [vmem:[#allocation4] sm:$0x1] %v2292_v1 }
  0xa8 PF: > { %v1832_v2 = vld [vmem:[%s2593_s1 + $0x38] sm:$0xff]   ;;  %v1833_v3 = vld [vmem:[%s2593_s1 + $0x30] sm:$0xff]   ;;  %v1834_v4 = vld [vmem:[%s2593_s1 + $0x28] sm:$0xff]   ;;  %s3179_s8 = sld [smem:[#allocation28_spill]]  ;;  %v861_v26 = vlaneseq }
  0xa9   : > { %1627 = vmatprep.subr.bf16.mxu0 %v1832_v2  ;;  %1675 = vmatprep.subr.bf16.mxu1 %v1832_v2  ;;  %v1840_v5 = vld [vmem:[%s2579_s16] sm:$0xff]   ;;  %v1836_v8 = vld [vmem:[%s2593_s1 + $0x18] sm:$0xff]   ;;  %v1837_v9 = vld [vmem:[%s2593_s1 + $0x10] sm:$0xff]  }
  0xaa   : > { %1628 = vmatpush3.bf16.xpose.msra.mxu0 %v1832_v2  ;;  %1683 = vmatpush3.bf16.xpose.msra.mxu1 %v1832_v2  ;;  %v1842_v6 = vld [vmem:[%s2579_s16 + $0x40] sm:$0xff]   ;;  %v1838_v10 = vld [vmem:[%s2593_s1 + $0x8] sm:$0xff]   ;;  %v1844_v14 = vld [vmem:[%s2579_s16 + $0x10] sm:$0xff]   ;;  %v2636_v27 = vshrl.u32 %v861_v26, 7 }
  0xab   : > { %1629 = vmatprep.subr.bf16.mxu0 %v1833_v3  ;;  %1676 = vmatprep.subr.bf16.mxu1 %v1833_v3  ;;  %v1835_v7 = vld [vmem:[%s2593_s1 + $0x20] sm:$0xff]   ;;  %v1841_v12 = vld [vmem:[%s2579_s16 + $0x8] sm:$0xff]   ;;  %v1846_v15 = vld [vmem:[%s2579_s16 + $0x50] sm:$0xff]  }
  0xac   : > { %1643 = vmatprep.mubr.bf16.mxu0 %v1840_v5  ;;  %1659 = vmatprep.mubr.bf16.mxu1 %v1842_v6  ;;  %v1839_v11 = vld [vmem:[%s2593_s1] sm:$0xff]   ;;  %v1843_v13 = vld [vmem:[%s2579_s16 + $0x48] sm:$0xff]   ;;  %v1845_v16 = vld [vmem:[%s2579_s16 + $0x18] sm:$0xff]   ;;  %v863_v28 = vadd.s32 8, %v2636_v27  ;;  %v864_v29 = vadd.s32 16, %v2636_v27  ;;  %v974_v30 = vsub.s32 0, %v2636_v27 }
  0xad   : > { %v1847_v17 = vld [vmem:[%s2579_s16 + $0x58] sm:$0xff]   ;;  %v1848_v18 = vld [vmem:[%s2579_s16 + $0x20] sm:$0xff]   ;;  %v1849_v20 = vld [vmem:[%s2579_s16 + $0x28] sm:$0xff]   ;;  %v865_v36 = vadd.s32 24, %v2636_v27  ;;  %v866_v42 = vadd.s32 32, %v2636_v27  ;;  %v867_v47 = vadd.s32 40, %v2636_v27 }
  0xae   : > { %v1850_v19 = vld [vmem:[%s2579_s16 + $0x60] sm:$0xff]   ;;  %v1851_v21 = vld [vmem:[%s2579_s16 + $0x68] sm:$0xff]   ;;  %v1852_v22 = vld [vmem:[%s2579_s16 + $0x30] sm:$0xff]   ;;  %s1592_s20 = sshll.u32 %s3179_s8, 8  ;;  %v868_v50 = vadd.s32 48, %v2636_v27  ;;  %v869_v59 = vadd.s32 56, %v2636_v27 }
  0xaf   : > { %v1854_v23 = vld [vmem:[%s2579_s16 + $0x70] sm:$0xff]   ;;  %v1853_v24 = vld [vmem:[%s2579_s16 + $0x38] sm:$0xff]   ;;  %v2646_v32 = vstv %s1592_s20  ;;  %p1593_p13 = scmp.ne.s32.totalorder %s3179_s8, 3 }
  0xb0   : > { %v1855_v25 = vld [vmem:[%s2579_s16 + $0x78] sm:$0xff]   ;;  %v895_v34 = vadd.s32 %v2646_v32, %v2636_v27  ;;  %v896_v37 = vadd.s32 %v2646_v32, %v863_v28  ;;  %v897_v38 = vadd.s32 %v2646_v32, %v864_v29  ;;  %v898_v45 = vadd.s32 %v2646_v32, %v865_v36 }
  0xb1   : > { %v2644_v31 = vld [vmem:[%s419_s23] sm:$0x1]  ;;  %v899_v52 = vadd.s32 %v2646_v32, %v866_v42  ;;  %v900_v60 = vadd.s32 %v2646_v32, %v867_v47  ;;  %v901_v0 = vadd.s32 %v2646_v32, %v868_v50  ;;  %v875_v47 = vadd.s32 104, %v2636_v27 }
  0xb2   : > { %1630 = vmatpush3.bf16.xpose.msra.mxu0 %v1833_v3  ;;  %1684 = vmatpush3.bf16.xpose.msra.mxu1 %v1833_v3  ;;  %v2660_v39 = vrot.slane %v2644_v31, %v974_v30  ;;  %v870_v3 = vadd.s32 64, %v2636_v27 }
  0xb3   : > { %1631 = vmatprep.subr.bf16.mxu0 %v1834_v4  ;;  %1677 = vmatprep.subr.bf16.mxu1 %v1834_v4 }
  0xb4   : > { %vm1117_vm0 = vcmp.eq.s32.totalorder %v895_v34, %v2660_v39  ;;  %vm1118_vm1 = vcmp.eq.s32.totalorder %v896_v37, %v2660_v39  ;;  %vm1119_vm2 = vcmp.eq.s32.totalorder %v897_v38, %v2660_v39  ;;  %vm1120_vm3 = vcmp.eq.s32.totalorder %v898_v45, %v2660_v39 }
  0xb5   : > { %vm1121_vm4 = vcmp.eq.s32.totalorder %v899_v52, %v2660_v39  ;;  %vm1122_vm5 = vcmp.eq.s32.totalorder %v900_v60, %v2660_v39  ;;  %vm1123_vm6 = vcmp.eq.s32.totalorder %v901_v0, %v2660_v39  ;;  %v874_v37 = vadd.s32 96, %v2636_v27 }
  0xb6   : > { %v877_v0 = vadd.s32 120, %v2636_v27 }
  0xba   : > { %1632 = vmatpush3.bf16.xpose.msra.mxu0 %v1834_v4  ;;  %1685 = vmatpush3.bf16.xpose.msra.mxu1 %v1834_v4 }
  0xbb   : > { %1633 = vmatprep.subr.bf16.mxu0 %v1835_v7  ;;  %1678 = vmatprep.subr.bf16.mxu1 %v1835_v7 }
  0xc2   : > { %1634 = vmatpush3.bf16.xpose.msra.mxu0 %v1835_v7  ;;  %1686 = vmatpush3.bf16.xpose.msra.mxu1 %v1835_v7 }
  0xc3   : > { %1635 = vmatprep.subr.bf16.mxu0 %v1836_v8  ;;  %1679 = vmatprep.subr.bf16.mxu1 %v1836_v8 }
  0xca   : > { %1636 = vmatpush3.bf16.xpose.msra.mxu0 %v1836_v8  ;;  %1687 = vmatpush3.bf16.xpose.msra.mxu1 %v1836_v8  ;;  %v902_v8 = vadd.s32 %v2646_v32, %v869_v59  ;;  %v907_v59 = vadd.s32 %v2646_v32, %v874_v37 }
  0xcb   : > { %1637 = vmatprep.subr.bf16.mxu0 %v1837_v9  ;;  %1680 = vmatprep.subr.bf16.mxu1 %v1837_v9 }
  0xcc   : > { %vm1124_vm7 = vcmp.eq.s32.totalorder %v902_v8, %v2660_v39  ;;  %vm1129_vm12 = vcmp.eq.s32.totalorder %v907_v59, %v2660_v39 }
  0xd2   : > { %1638 = vmatpush3.bf16.xpose.msra.mxu0 %v1837_v9  ;;  %1688 = vmatpush3.bf16.xpose.msra.mxu1 %v1837_v9 }
  0xd3   : > { %1639 = vmatprep.subr.bf16.mxu0 %v1838_v10  ;;  %1681 = vmatprep.subr.bf16.mxu1 %v1838_v10 }
  0xda   : > { %1640 = vmatpush3.bf16.xpose.msra.mxu0 %v1838_v10  ;;  %1689 = vmatpush3.bf16.xpose.msra.mxu1 %v1838_v10  ;;  %v871_v10 = vadd.s32 72, %v2636_v27 }
  0xdb   : > { %1641 = vmatprep.subr.bf16.mxu0 %v1839_v11  ;;  %1682 = vmatprep.subr.bf16.mxu1 %v1839_v11 }
  0xe2   : > { %1642 = vmatpush3.bf16.xpose.msra.mxu0 %v1839_v11  ;;  %1690 = vmatpush3.bf16.xpose.msra.mxu1 %v1839_v11 }
  0xe9   : > { %1644 = vmatmul.mubr.bf16.vlgmr.msra.gmra.mxu0 %v1841_v12  ;;  %1660 = vmatmul.mubr.bf16.vlgmr.msra.gmra.mxu1 %v1843_v13 }
  0xea   : > { %1647 = vmatprep.mubr.bf16.mxu0 %v1844_v14  ;;  %1663 = vmatprep.mubr.bf16.mxu1 %v1846_v15  ;;  %v872_v15 = vadd.s32 80, %v2636_v27 }
  0xec   : > { %v905_v29 = vadd.s32 %v2646_v32, %v872_v15 }
  0xee   : > { %vm1127_vm10 = vcmp.eq.s32.totalorder %v905_v29, %v2660_v39 }
  0xf1   : > { %1648 = vmatmul.mubr.bf16.gmra.mxu0 %v1845_v16  ;;  %1664 = vmatmul.mubr.bf16.gmra.mxu1 %v1847_v17  ;;  %v903_v17 = vadd.s32 %v2646_v32, %v870_v3  ;;  %v908_v3 = vadd.s32 %v2646_v32, %v875_v47 }
  0xf2   : > { %1651 = vmatprep.mubr.bf16.mxu0 %v1848_v18  ;;  %1667 = vmatprep.mubr.bf16.mxu1 %v1850_v19 }
  0xf3   : > { %vm1125_vm8 = vcmp.eq.s32.totalorder %v903_v17, %v2660_v39  ;;  %vm1130_vm13 = vcmp.eq.s32.totalorder %v908_v3, %v2660_v39 }
  0xf9   : > { %1652 = vmatmul.mubr.bf16.gmra.mxu0 %v1849_v20  ;;  %1668 = vmatmul.mubr.bf16.gmra.mxu1 %v1851_v21 }
  0xfa   : > { %1655 = vmatprep.mubr.bf16.mxu0 %v1852_v22  ;;  %1671 = vmatprep.mubr.bf16.mxu1 %v1854_v23  ;;  %v873_v23 = vadd.s32 88, %v2636_v27 }
  0xfc   : > { %v906_v45 = vadd.s32 %v2646_v32, %v873_v23 }
  0xfe   : > { %vm1128_vm11 = vcmp.eq.s32.totalorder %v906_v45, %v2660_v39 }
 0x101   : > { %1656 = vmatmul.mubr.bf16.gmra.mxu0 %v1853_v24  ;;  %1672 = vmatmul.mubr.bf16.gmra.mxu1 %v1855_v25  ;;  %v904_v24 = vadd.s32 %v2646_v32, %v871_v10  ;;  %v878_v10 = vadd.s32 128, %v2636_v27 }
 0x103   : > { %vm1126_vm9 = vcmp.eq.s32.totalorder %v904_v24, %v2660_v39 }
 0x1a9   : > { %v2648_v33 = vpop.f32.mrf.mxu0  ;;  %v2652_v35 = vpop.f32.mrf.mxu1 }
 0x1aa   : > { %v1151_v61 = vsel %vm1119_vm2, %v2648_v33, 0.0 }
 0x1ab   : > { %v2662_v40 = vpop.f32.mrf.mxu0  ;;  %v2664_v41 = vpop.f32.mrf.mxu1 }
 0x1ac   : > { %v941_v43 = vmax.f32 %v2664_v41, %v2652_v35  ;;  %v1149_v53 = vsel %vm1117_vm0, %v2662_v40, 0.0 }
 0x1ad   : > { %v2670_v44 = vpop.f32.mrf.mxu0  ;;  %v2674_v46 = vpop.f32.mrf.mxu1 }
 0x1ae   : > { %v939_v48 = vmax.f32 %v2674_v46, %v941_v43  ;;  %v1152_v4 = vsel %vm1120_vm3, %v2670_v44, 0.0 }
 0x1af   : > { %v2679_v49 = vpop.f32.mrf.mxu0  ;;  %v2682_v51 = vpop.f32.mrf.mxu1 }
 0x1b0   : > { %v1150_v54 = vsel %vm1118_vm1, %v2679_v49, 0.0  ;;  %v945_v55 = vmax.f32 %v2682_v51, %v939_v48 }
 0x1b1   : > { %v1181_v56 = vadd.f32 %v1150_v54, %v1149_v53  ;;  %v2689_v57 = vpop.f32.mrf.mxu0  ;;  %v2691_v58 = vpop.f32.mrf.mxu1 }
 0x1b2   : > { %v949_v62 = vmax.f32 %v945_v55, %v2691_v58  ;;  %v1155_v25 = vsel %vm1123_vm6, %v2689_v57, 0.0  ;;  %v929_v48 = vmax.f32 %v2648_v33, %v2689_v57 }
 0x1b3   : > { %v1182_v63 = vadd.f32 %v1181_v56, %v1151_v61  ;;  %v2698_v1 = vpop.f32.mrf.mxu0  ;;  %v2701_v2 = vpop.f32.mrf.mxu1  ;;  %v876_v56 = vadd.s32 112, %v2636_v27 }
 0x1b4   : > { %v953_v5 = vmax.f32 %v949_v62, %v2701_v2  ;;  %v1153_v11 = vsel %vm1121_vm4, %v2698_v1, 0.0 }
 0x1b5   : > { %v1183_v6 = vadd.f32 %v1182_v63, %v1152_v4  ;;  %v2706_v7 = vpop.f32.mrf.mxu0  ;;  %v2710_v9 = vpop.f32.mrf.mxu1  ;;  %v927_v4 = vmax.f32 %v2662_v40, %v2698_v1 }
 0x1b6   : > { %v942_v12 = vmax.f32 %v2710_v9, %v953_v5  ;;  %v1156_v38 = vsel %vm1124_vm7, %v2706_v7, 0.0 }
 0x1b7   : > { %v1184_v13 = vadd.f32 %v1183_v6, %v1153_v11  ;;  %v2716_v14 = vpop.f32.mrf.mxu0  ;;  %v2719_v16 = vpop.f32.mrf.mxu1 }
 0x1b8   : > { %v1154_v18 = vsel %vm1122_vm5, %v2716_v14, 0.0  ;;  %v943_v19 = vmax.f32 %v2719_v16, %v942_v12  ;;  %v909_v12 = vadd.s32 %v2646_v32, %v876_v56  ;;  %v881_v56 = vadd.s32 152, %v2636_v27 }
 0x1b9   : > { %v1185_v20 = vadd.f32 %v1184_v13, %v1154_v18  ;;  %v2725_v21 = vpop.f32.mrf.mxu0  ;;  %v2727_v22 = vpop.f32.mrf.mxu1 }
 0x1ba   : > { %v947_v26 = vmax.f32 %v943_v19, %v2727_v22  ;;  %v933_v60 = vmax.f32 %v929_v48, %v2725_v21  ;;  %v1159_v5 = vsel %vm1127_vm10, %v2725_v21, 0.0  ;;  %v879_v19 = vadd.s32 136, %v2636_v27 }
 0x1bb   : > { %v1186_v28 = vadd.f32 %v1185_v20, %v1155_v25  ;;  %v2734_v34 = vpop.f32.mrf.mxu0  ;;  %v2737_v36 = vpop.f32.mrf.mxu1  ;;  %v910_v25 = vadd.s32 %v2646_v32, %v877_v0  ;;  %vm1131_vm14 = vcmp.eq.s32.totalorder %v909_v12, %v2660_v39 }
 0x1bc   : > { %v1157_v50 = vsel %vm1125_vm8, %v2734_v34, 0.0  ;;  %v951_v52 = vmax.f32 %v947_v26, %v2737_v36  ;;  %v931_v15 = vmax.f32 %v927_v4, %v2734_v34  ;;  %v930_v26 = vmax.f32 %v2670_v44, %v2706_v7 }
 0x1bd   : > { %v1187_v42 = vadd.f32 %v1186_v28, %v1156_v38  ;;  %v2741_v43 = vpop.f32.mrf.mxu0  ;;  %v2753_v55 = vpop.f32.mrf.mxu1  ;;  %v880_v38 = vadd.s32 144, %v2636_v27  ;;  %v912_v59 = vadd.s32 %v2646_v32, %v879_v19  ;;  %vm1132_vm15 = vcmp.eq.s32.totalorder %v910_v25, %v2660_v39 }
 0x1be   : > { %v940_v6 = vmax.f32 %v2753_v55, %v951_v52  ;;  %v1160_v17 = vsel %vm1128_vm11, %v2741_v43, 0.0 }
 0x1bf   : > { %v1188_v53 = vadd.f32 %v1187_v42, %v1157_v50  ;;  %v2751_v54 = vpop.f32.mrf.mxu0  ;;  %v2777_v20 = vpop.f32.mrf.mxu1  ;;  %v911_v42 = vadd.s32 %v2646_v32, %v878_v10  ;;  %v934_v50 = vmax.f32 %v930_v26, %v2741_v43  ;;  %v913_v4 = vadd.s32 %v2646_v32, %v880_v38 }
 0x1c0   : > { %v1158_v61 = vsel %vm1126_vm9, %v2751_v54, 0.0  ;;  %vm1134_vm1 = vcmp.eq.s32.totalorder %v912_v59, %v2660_v39 }
 0x1c1   : > { %v1189_v62 = vadd.f32 %v1188_v53, %v1158_v61  ;;  %v2760_v63 = vpop.f32.mrf.mxu0  ;;  %v2791_v47 = vpop.f32.mrf.mxu1  ;;  %v928_v61 = vmax.f32 %v2679_v49, %v2716_v14  ;;  %vm1133_vm0 = vcmp.eq.s32.totalorder %v911_v42, %v2660_v39  ;;  %vm1135_vm2 = vcmp.eq.s32.totalorder %v913_v4, %v2660_v39 }
 0x1c2   : > { %v937_v8 = vmax.f32 %v933_v60, %v2760_v63  ;;  %v1165_v19 = vsel %vm1133_vm0, %v2664_v41, 0.0  ;;  %v884_v42 = vadd.s32 176, %v2636_v27 }
 0x1c3   : > { %v1190_v11 = vadd.f32 %v1189_v62, %v1159_v5  ;;  %v2771_v13 = vpop.f32.mrf.mxu0  ;;  %v1163_v62 = vsel %vm1131_vm14, %v2760_v63, 0.0  ;;  %v882_v5 = vadd.s32 160, %v2636_v27  ;;  %v932_v10 = vmax.f32 %v928_v61, %v2751_v54 }
 0x1c4   : > { %v946_v18 = vmax.f32 %v937_v8, %v940_v6  ;;  %v935_v29 = vmax.f32 %v931_v15, %v2771_v13  ;;  %v1161_v37 = vsel %vm1129_vm12, %v2771_v13, 0.0  ;;  %v2808_v6 = vpop.f32.mrf.mxu1  ;;  %v914_v15 = vadd.s32 %v2646_v32, %v881_v56 }
 0x1c5   : > { %v1191_v23 = vadd.f32 %v1190_v11, %v1160_v17  ;;  %v2779_v24 = vpop.f32.mrf.mxu0  ;;  %v883_v17 = vadd.s32 168, %v2636_v27  ;;  %v915_v26 = vadd.s32 %v2646_v32, %v882_v5 }
 0x1c6   : > { %v950_v28 = vmax.f32 %v946_v18, %v2777_v20  ;;  %v938_v3 = vmax.f32 %v934_v50, %v2779_v24  ;;  %v1164_v12 = vsel %vm1132_vm15, %v2779_v24, 0.0  ;;  %vm1136_vm3 = vcmp.eq.s32.totalorder %v914_v15, %v2660_v39 }
 0x1c7   : > { %v1192_v45 = vadd.f32 %v1191_v23, %v1161_v37  ;;  %v2793_v48 = vpop.f32.mrf.mxu0  ;;  %v1166_v37 = vsel %vm1134_vm1, %v2682_v51, 0.0  ;;  %vm1137_vm4 = vcmp.eq.s32.totalorder %v915_v26, %v2660_v39  ;;  %v886_v15 = vadd.s32 192, %v2636_v27 }
 0x1c8   : > { %v954_v52 = vmax.f32 %v950_v28, %v935_v29  ;;  %v1162_v53 = vsel %vm1130_vm13, %v2793_v48, 0.0  ;;  %v936_v25 = vmax.f32 %v932_v10, %v2793_v48  ;;  %v2820_v29 = vpop.f32.mrf.mxu1  ;;  %v1169_v4 = vsel %vm1137_vm4, %v2701_v2, 0.0 }
 0x1c9   : > { %v1193_v60 = vadd.f32 %v1192_v45, %v1162_v53  ;;  %v916_v45 = vadd.s32 %v2646_v32, %v883_v17  ;;  %v887_v26 = vadd.s32 200, %v2636_v27 }
 0x1ca   : > { %v956_v0 = vmax.f32 %v2791_v47, %v954_v52  ;;  %v1167_v52 = vsel %vm1135_vm2, %v2652_v35, 0.0  ;;  %v2829_v59 = vpop.f32.mrf.mxu1 }
 0x1cb   : > { %v1194_v8 = vadd.f32 %v1193_v60, %v1163_v62  ;;  %v1168_v60 = vsel %vm1136_vm3, %v2674_v46, 0.0  ;;  %v917_v62 = vadd.s32 %v2646_v32, %v884_v42  ;;  %vm1138_vm5 = vcmp.eq.s32.totalorder %v916_v45, %v2660_v39 }
 0x1cc   : > { %v944_v11 = vmax.f32 %v938_v3, %v956_v0  ;;  %v885_v0 = vadd.s32 184, %v2636_v27  ;;  %v1170_v10 = vsel %vm1138_vm5, %v2719_v16, 0.0 }
 0x1cd   : > { %v1195_v18 = vadd.f32 %v1194_v8, %v1164_v12  ;;  %vm1139_vm6 = vcmp.eq.s32.totalorder %v917_v62, %v2660_v39 }
 0x1ce   : > { %v948_v23 = vmax.f32 %v944_v11, %v2808_v6  ;;  %v918_v12 = vadd.s32 %v2646_v32, %v885_v0  ;;  %v889_v0 = vadd.s32 216, %v2636_v27 }
 0x1cf   : > { %v1196_v28 = vadd.f32 %v1195_v18, %v1165_v19  ;;  %v1171_v19 = vsel %vm1139_vm6, %v2691_v58, 0.0 }
 0x1d0   : > { %v952_v38 = vmax.f32 %v948_v23, %v936_v25  ;;  %vm1140_vm7 = vcmp.eq.s32.totalorder %v918_v12, %v2660_v39  ;;  %v919_v25 = vadd.s32 %v2646_v32, %v886_v15 }
 0x1d1   : > { %v1197_v50 = vadd.f32 %v1196_v28, %v1166_v37  ;;  %v1172_v42 = vsel %vm1140_vm7, %v2710_v9, 0.0 }
 0x1d2   : > { %v955_v53 = vmax.f32 %v2820_v29, %v952_v38  ;;  %v2845_v38 = vld [vmem:[#allocation2] sm:$0x1]  ;;  %vm1141_vm8 = vcmp.eq.s32.totalorder %v919_v25, %v2660_v39 }
 0x1d3   : > { %v1198_v56 = vadd.f32 %v1197_v50, %v1167_v52  ;;  %v888_v50 = vadd.s32 208, %v2636_v27  ;;  %v920_v52 = vadd.s32 %v2646_v32, %v887_v26 }
 0x1d4   : > { %v957_v61 = vmax.f32 %v955_v53, %v2829_v59 }
 0x1d5   : > { %v1199_v3 = vadd.f32 %v1198_v56, %v1168_v60  ;;  %v1173_v60 = vsel %vm1141_vm8, %v2737_v36, 0.0  ;;  %v921_v62 = vadd.s32 %v2646_v32, %v888_v50  ;;  %vm1142_vm9 = vcmp.eq.s32.totalorder %v920_v52, %v2660_v39 }
 0x1d6   : > { %v958_v5 = vrot.slane %v957_v61, 4 }
 0x1d7   : > { %v1200_v8 = vadd.f32 %v1199_v3, %v1169_v4  ;;  %vm1143_vm10 = vcmp.eq.s32.totalorder %v921_v62, %v2660_v39 }
 0x1d8   : > { %v959_v11 = vmax.f32 %v957_v61, %v958_v5  ;;  %v1174_v5 = vsel %vm1142_vm9, %v2777_v20, 0.0 }
 0x1d9   : > { %v1201_v17 = vadd.f32 %v1200_v8, %v1170_v10  ;;  %v890_v8 = vadd.s32 224, %v2636_v27  ;;  %v922_v10 = vadd.s32 %v2646_v32, %v889_v0 }
 0x1da   : > { %v960_v18 = vrot.slane %v959_v11, 2 }
 0x1db   : > { %v1202_v28 = vadd.f32 %v1201_v17, %v1171_v19  ;;  %v891_v19 = vadd.s32 232, %v2636_v27  ;;  %vm1144_vm11 = vcmp.eq.s32.totalorder %v922_v10, %v2660_v39 }
 0x1dc   : > { %v961_v23 = vmax.f32 %v959_v11, %v960_v18  ;;  %v923_v18 = vadd.s32 %v2646_v32, %v890_v8 }
 0x1dd   : > { %v1203_v53 = vadd.f32 %v1202_v28, %v1172_v42  ;;  %v892_v28 = vadd.s32 240, %v2636_v27  ;;  %v1176_v42 = vsel %vm1144_vm11, %v2753_v55, 0.0 }
 0x1de   : > { %v962_v37 = vrot.slane %v961_v23, 1  ;;  %vm1145_vm12 = vcmp.eq.s32.totalorder %v923_v18, %v2660_v39 }
 0x1df   : > { %v1204_v3 = vadd.f32 %v1203_v53, %v1173_v60  ;;  %v925_v53 = vadd.s32 %v2646_v32, %v892_v28  ;;  %v1177_v60 = vsel %vm1145_vm12, %v2808_v6, 0.0 }
 0x1e0   : > { %v963_v45 = vmax.f32 %v961_v23, %v962_v37 }
 0x1e1   : > { %v1205_v11 = vadd.f32 %v1204_v3, %v1174_v5  ;;  %vm1147_vm14 = vcmp.eq.s32.totalorder %v925_v53, %v2660_v39 }
 0x1e2   : > { %v2852_v56 = vmax.f32 %v2845_v38, %v963_v45  ;;  %v924_v45 = vadd.s32 %v2646_v32, %v891_v19 }
 0x1e4   : > { %v967_v61 = vsub.f32 %v2845_v38, %v2852_v56  ;;  %1220 = vst [vmem:[#allocation2] sm:$0x1] %v2852_v56  ;;  %v2864_v4 = vrot.slane %v2852_v56, %v974_v30  ;;  %v1175_v30 = vsel %vm1143_vm10, %v2727_v22, 0.0  ;;  %vm1146_vm13 = vcmp.eq.s32.totalorder %v924_v45, %v2660_v39 }
 0x1e5   : > { %v1206_v25 = vadd.f32 %v1205_v11, %v1175_v30  ;;  %v1178_v8 = vsel %vm1146_vm13, %v2829_v59, 0.0  ;;  %v1179_v11 = vsel %vm1147_vm14, %v2791_v47, 0.0 }
 0x1e6   : > { %v977_v12 = vsub.f32 %v2662_v40, %v2864_v4  ;;  %v978_v15 = vsub.f32 %v2679_v49, %v2864_v4  ;;  %v979_v17 = vsub.f32 %v2648_v33, %v2864_v4  ;;  %v980_v23 = vsub.f32 %v2670_v44, %v2864_v4 }
 0x1e7   : > { %v893_v49 = vadd.s32 248, %v2636_v27  ;;  %v981_v33 = vsub.f32 %v2698_v1, %v2864_v4  ;;  %v982_v44 = vsub.f32 %v2716_v14, %v2864_v4  ;;  %v1207_v52 = vadd.f32 %v1206_v25, %v1176_v42 }
 0x1e8   : > { %v1009_v26 = vmul.f32 1.442695, %v977_v12  ;;  %v1011_v40 = vmul.f32 1.442695, %v978_v15  ;;  %v1013_v37 = vmul.f32 1.442695, %v979_v17  ;;  %v983_v27 = vsub.f32 %v2689_v57, %v2864_v4 }
 0x1e9   : > { %v1015_v50 = vmul.f32 1.442695, %v980_v23  ;;  %v1017_v1 = vmul.f32 1.442695, %v981_v33  ;;  %v926_v62 = vadd.s32 %v2646_v32, %v893_v49  ;;  %v984_v0 = vsub.f32 %v2706_v7, %v2864_v4 }
 0x1ea   : > { %1856 = vpow2.f32 %v1009_v26  ;;  %v1019_v14 = vmul.f32 1.442695, %v982_v44  ;;  %v1208_v3 = vadd.f32 %v1207_v52, %v1177_v60  ;;  %v985_v5 = vsub.f32 %v2734_v34, %v2864_v4 }
 0x1eb   : > { %1858 = vpow2.f32 %v1011_v40  ;;  %v1021_v57 = vmul.f32 1.442695, %v983_v27  ;;  %vm1148_vm15 = vcmp.eq.s32.totalorder %v926_v62, %v2660_v39  ;;  %v986_v32 = vsub.f32 %v2751_v54, %v2864_v4 }
 0x1ec   : > { %1860 = vpow2.f32 %v1013_v37  ;;  %v1023_v10 = vmul.f32 1.442695, %v984_v0  ;;  %v1209_v7 = vadd.f32 %v1208_v3, %v1178_v8  ;;  %v987_v12 = vsub.f32 %v2725_v21, %v2864_v4 }
 0x1ed   : > { %1862 = vpow2.f32 %v1015_v50  ;;  %v1025_v15 = vmul.f32 1.442695, %v985_v5  ;;  %v1180_v17 = vsel %vm1148_vm15, %v2820_v29, 0.0  ;;  %v988_v39 = vsub.f32 %v2741_v43, %v2864_v4  ;;  %v1112_v5 = vld [vmem:[#allocation4] sm:$0x1] }
 0x1ee   : > { %1864 = vpow2.f32 %v1017_v1  ;;  %v1210_v34 = vadd.f32 %v1209_v7, %v1179_v11  ;;  %v1027_v18 = vmul.f32 1.442695, %v986_v32  ;;  %v989_v23 = vsub.f32 %v2771_v13, %v2864_v4 }
 0x1ef   : > { %1866 = vpow2.f32 %v1019_v14  ;;  %v1029_v25 = vmul.f32 1.442695, %v987_v12  ;;  %v990_v28 = vsub.f32 %v2793_v48, %v2864_v4  ;;  %v1031_v49 = vmul.f32 1.442695, %v988_v39 }
 0x1f0   : > { %1868 = vpow2.f32 %v1021_v57  ;;  %v1211_v54 = vadd.f32 %v1210_v34, %v1180_v17  ;;  %v991_v42 = vsub.f32 %v2760_v63, %v2864_v4  ;;  %v1033_v45 = vmul.f32 1.442695, %v989_v23 }
 0x1f1   : > { %1870 = vpow2.f32 %v1023_v10  ;;  %v992_v52 = vsub.f32 %v2779_v24, %v2864_v4  ;;  %v1035_v53 = vmul.f32 1.442695, %v990_v28  ;;  %v993_v60 = vsub.f32 %v2664_v41, %v2864_v4 }
 0x1f2   : > { %1872 = vpow2.f32 %v1025_v15  ;;  %v1212_v21 = vrot.slane %v1211_v54, 4  ;;  %v1037_v62 = vmul.f32 1.442695, %v991_v42  ;;  %v994_v3 = vsub.f32 %v2682_v51, %v2864_v4 }
 0x1f3   : > { %1874 = vpow2.f32 %v1027_v18  ;;  %v1039_v57 = vmul.f32 1.442695, %v992_v52  ;;  %v995_v10 = vsub.f32 %v2652_v35, %v2864_v4  ;;  %v1041_v7 = vmul.f32 1.442695, %v993_v60 }
 0x1f4   : > { %v1213_v37 = vadd.f32 %v1212_v21, %v1211_v54  ;;  %1876 = vpow2.f32 %v1029_v25  ;;  %v996_v15 = vsub.f32 %v2674_v46, %v2864_v4  ;;  %v1043_v34 = vmul.f32 1.442695, %v994_v3 }
 0x1f5   : > { %1878 = vpow2.f32 %v1031_v49  ;;  %v1045_v39 = vmul.f32 1.442695, %v995_v10  ;;  %v998_v54 = vsub.f32 %v2719_v16, %v2864_v4  ;;  %v999_v46 = vsub.f32 %v2691_v58, %v2864_v4 }
 0x1f6   : > { %v1214_v13 = vrot.slane %v1213_v37, 2  ;;  %1880 = vpow2.f32 %v1033_v45  ;;  %v1001_v16 = vsub.f32 %v2737_v36, %v2864_v4  ;;  %v1002_v58 = vsub.f32 %v2777_v20, %v2864_v4 }
 0x1f7   : > { %v1857_v30 = vpop.eup %1856  ;;  %1882 = vpow2.f32 %v1035_v53  ;;  %v1051_v28 = vmul.f32 1.442695, %v998_v54  ;;  %v1004_v36 = vsub.f32 %v2753_v55, %v2864_v4  ;;  %v1005_v20 = vsub.f32 %v2808_v6, %v2864_v4 }
 0x1f8   : > { %v1859_v19 = vpop.eup %1858  ;;  %v1215_v48 = vadd.f32 %v1214_v13, %v1213_v37  ;;  %1884 = vpow2.f32 %v1037_v62  ;;  %v1053_v37 = vmul.f32 1.442695, %v999_v46  ;;  %v1007_v55 = vsub.f32 %v2791_v47, %v2864_v4 }
 0x1f9   : > { %v1073_v26 = vadd.f32 %v1859_v19, %v1857_v30  ;;  %v1861_v40 = vpop.eup %1860  ;;  %1886 = vpow2.f32 %v1039_v57  ;;  %v997_v30 = vsub.f32 %v2701_v2, %v2864_v4  ;;  %v1047_v19 = vmul.f32 1.442695, %v996_v15 }
 0x1fa   : > { %v1863_v43 = vpop.eup %1862  ;;  %v1216_v63 = vrot.slane %v1215_v48, 1  ;;  %1888 = vpow2.f32 %v1041_v7  ;;  %v1000_v2 = vsub.f32 %v2710_v9, %v2864_v4  ;;  %v1003_v9 = vsub.f32 %v2727_v22, %v2864_v4 }
 0x1fb   : > { %v1074_v33 = vadd.f32 %v1861_v40, %v1073_v26  ;;  %v1865_v50 = vpop.eup %1864  ;;  %1890 = vpow2.f32 %v1043_v34  ;;  %v1049_v26 = vmul.f32 1.442695, %v997_v30  ;;  %v1006_v22 = vsub.f32 %v2829_v59, %v2864_v4 }
 0x1fc   : > { %v1867_v1 = vpop.eup %1866  ;;  %v1217_v8 = vadd.f32 %v1216_v63, %v1215_v48  ;;  %1892 = vpow2.f32 %v1045_v39  ;;  %v1055_v45 = vmul.f32 1.442695, %v1000_v2  ;;  %v1061_v60 = vmul.f32 1.442695, %v1003_v9 }
 0x1fd   : > { %v1075_v44 = vadd.f32 %v1863_v43, %v1074_v33  ;;  %v1869_v14 = vpop.eup %1868  ;;  %1894 = vpow2.f32 %v1047_v19  ;;  %v1063_v63 = vmul.f32 1.442695, %v1004_v36  ;;  %v1008_v6 = vsub.f32 %v2820_v29, %v2864_v4 }
 0x1fe   : > { %v1871_v32 = vpop.eup %1870  ;;  %v1218_v11 = vadd.f32 %v1217_v8, %v1112_v5  ;;  %1896 = vpow2.f32 %v1049_v26  ;;  %v1065_v5 = vmul.f32 1.442695, %v1005_v20  ;;  %v1067_v8 = vmul.f32 1.442695, %v1006_v22 }
 0x1ff   : > { %v1076_v27 = vadd.f32 %v1865_v50, %v1075_v44  ;;  %v1873_v12 = vpop.eup %1872  ;;  %1898 = vpow2.f32 %v1051_v28  ;;  %v1057_v50 = vmul.f32 1.442695, %v1001_v16  ;;  %v1069_v59 = vmul.f32 1.442695, %v1007_v55 }
 0x200   : > { %1219 = vst [vmem:[#allocation4] sm:$0x1] %v1218_v11  ;;  %v1875_v17 = vpop.eup %1874  ;;  %1900 = vpow2.f32 %v1053_v37  ;;  %v1071_v11 = vmul.f32 1.442695, %v1008_v6  ;;  %v966_v37 = vld [vmem:[#allocation3] sm:$0x1] }
 0x201   : > { %v1077_v0 = vadd.f32 %v1867_v1, %v1076_v27  ;;  %v1877_v35 = vpop.eup %1876  ;;  %1902 = vpow2.f32 %v1055_v45  ;;  %v1059_v27 = vmul.f32 1.442695, %v1002_v58 }
 0x202   : > { %v1879_v25 = vpop.eup %1878  ;;  %1904 = vpow2.f32 %v1057_v50 }
 0x203   : > { %v1078_v24 = vadd.f32 %v1869_v14, %v1077_v0  ;;  %v1881_v40 = vpop.eup %1880  ;;  %1906 = vpow2.f32 %v1059_v27 }
 0x204   : > { %v1883_v33 = vpop.eup %1882  ;;  %1908 = vpow2.f32 %v1061_v60 }
 0x205   : > { %v1079_v41 = vadd.f32 %v1871_v32, %v1078_v24  ;;  %v1885_v42 = vpop.eup %1884  ;;  %1910 = vpow2.f32 %v1063_v63 }
 0x206   : > { %v1887_v13 = vpop.eup %1886  ;;  %1912 = vpow2.f32 %v1065_v5 }
 0x207   : > { %v1080_v51 = vadd.f32 %v1873_v12, %v1079_v41  ;;  %v1889_v53 = vpop.eup %1888  ;;  %1914 = vpow2.f32 %v1067_v8 }
 0x208   : > { %v1891_v1 = vpop.eup %1890  ;;  %1916 = vpow2.f32 %v1069_v59 }
 0x209   : > { %v1081_v18 = vadd.f32 %v1875_v17, %v1080_v51  ;;  %v1893_v0 = vpop.eup %1892  ;;  %1918 = vpow2.f32 %v1071_v11 }
 0x20a   : > { %v1895_v3 = vpop.eup %1894 }
 0x20b   : > { %v1082_v23 = vadd.f32 %v1877_v35, %v1081_v18  ;;  %v1897_v24 = vpop.eup %1896  ;;  %v968_v18 = vmul.f32 1.442695, %v967_v61 }
 0x20c   : > { %v1899_v10 = vpop.eup %1898 }
 0x20d   : > { %v1083_v21 = vadd.f32 %v1879_v25, %v1082_v23  ;;  %v1901_v41 = vpop.eup %1900  ;;  %1920 = vpow2.f32 %v968_v18 }
 0x20e   : > { %v1903_v15 = vpop.eup %1902 }
 0x20f   : > { %v1084_v49 = vadd.f32 %v1881_v40, %v1083_v21  ;;  %v1905_v34 = vpop.eup %1904 }
 0x210   : > { %v1907_v17 = vpop.eup %1906 }
 0x211   : > { %v1085_v43 = vadd.f32 %v1883_v33, %v1084_v49  ;;  %v1909_v29 = vpop.eup %1908 }
 0x212   : > { %v1911_v39 = vpop.eup %1910 }
 0x213   : > { %v1086_v44 = vadd.f32 %v1885_v42, %v1085_v43  ;;  %v1913_v54 = vpop.eup %1912 }
 0x214   : > { %v1915_v23 = vpop.eup %1914 }
 0x215   : > { %v1087_v52 = vadd.f32 %v1887_v13, %v1086_v44  ;;  %v1917_v46 = vpop.eup %1916 }
 0x216   : > { %v1919_v21 = vpop.eup %1918 }
 0x217   : > { %v1088_v48 = vadd.f32 %v1889_v53, %v1087_v52 }
 0x219   : > { %v1089_v62 = vadd.f32 %v1891_v1, %v1088_v48 }
 0x21a   : > { %v1921_v16 = vpop.eup %1920 }
 0x21b   : > { %v1090_v14 = vadd.f32 %v1893_v0, %v1089_v62  ;;  %v970_v42 = vmul.f32 %v1921_v16, %v966_v37 }
 0x21d   : > { %v1091_v57 = vadd.f32 %v1895_v3, %v1090_v14 }
 0x21f   : > { %v1092_v32 = vadd.f32 %v1897_v24, %v1091_v57 }
 0x221   : > { %v1093_v7 = vadd.f32 %v1899_v10, %v1092_v32 }
 0x223   : > { %v1094_v12 = vadd.f32 %v1901_v41, %v1093_v7 }
 0x225   : > { %v1095_v47 = vadd.f32 %v1903_v15, %v1094_v12 }
 0x227   : > { %v1096_v51 = vadd.f32 %v1905_v34, %v1095_v47 }
 0x229   : > { %v1097_v30 = vadd.f32 %v1907_v17, %v1096_v51 }
 0x22b   : > { %v1098_v4 = vadd.f32 %v1909_v29, %v1097_v30 }
 0x22d   : > { %v1099_v35 = vadd.f32 %v1911_v39, %v1098_v4 }
 0x22f   : > { %v1100_v19 = vadd.f32 %v1913_v54, %v1099_v35 }
 0x231   : > { %v1101_v25 = vadd.f32 %v1915_v23, %v1100_v19 }
 0x233   : > { %v1102_v26 = vadd.f32 %v1917_v46, %v1101_v25 }
 0x235   : > { %v1103_v40 = vadd.f32 %v1919_v21, %v1102_v26 }
 0x237   : > { %v1104_v2 = vrot.slane %v1103_v40, 4 }
 0x239   : > { %v1105_v28 = vadd.f32 %v1104_v2, %v1103_v40 }
 0x23b   : > { %v1106_v49 = vrot.slane %v1105_v28, 2 }
 0x23d   : > { %v1107_v33 = vadd.f32 %v1106_v49, %v1105_v28 }
 0x23f   : > { %v1108_v43 = vrot.slane %v1107_v33, 1 }
 0x241   : > { %v1109_v38 = vadd.f32 %v1108_v43, %v1107_v33  ;;  %1224 = sbr.rel (%p1593_p13) target bundleno = 639 (0x27f), region = 68 }
 0x243   : > { %v1110_v56 = vadd.f32 %v1109_v38, %v970_v42 }
 0x245   : > { %1111 = vst [vmem:[#allocation3] sm:$0x1] %v1110_v56 }
 0x246   : > { %v1225_v45 = vld [vmem:[#allocation2] sm:$0x1]  ;;  %v1230_v13 = vld [vmem:[#allocation4] sm:$0x1]  ;;  %vm1232_vm0 = vcmp.eq.s32.totalorder %v2644_v31, 4294967196 }
 0x247   : > { %v1234_v52 = vld [vmem:[%s427_s13] sm:$0x1] }
 0x248   : > { %v1235_v20 = vld [vmem:[%s435_s21] sm:$0x1] }
 0x24c   : > { %v1226_v61 = vld [vmem:[#allocation3] sm:$0x1] }
 0x24d   : > { %1922 = vlog2.f32 %v1226_v61 }
 0x25a   : > { %v1923_v58 = vpop.eup %1922 }
 0x25b   : > { %v1228_v44 = vmul.f32 0.6931472, %v1923_v58 }
 0x25d   : > { %v1229_v9 = vadd.f32 %v1228_v44, %v1225_v45 }
 0x25f   : > { %v1231_v50 = vsub.f32 %v1230_v13, %v1229_v9 }
 0x261   : > { %v1233_v53 = vsel %vm1232_vm0, 0.0, %v1231_v50 }
 0x262   : > { %v1236_v36 = vsub.f32 %v1234_v52, %v1233_v53  ;;  %v1241_v27 = vsub.f32 %v1233_v53, %v1233_v53  ;;  %1248 = vst [vmem:[%s477_s14] sm:$0x1] %v1233_v53 }
 0x264   : > { %v1237_v48 = vmul.f32 1.442695, %v1236_v36  ;;  %v1242_v1 = vmul.f32 1.442695, %v1241_v27 }
 0x266   : > { %1924 = vpow2.f32 %v1237_v48 }
 0x267   : > { %1926 = vpow2.f32 %v1242_v1 }
 0x273   : > { %v1925_v60 = vpop.eup %1924 }
 0x274   : > { %v1927_v62 = vpop.eup %1926  ;;  %v1239_v31 = vsub.f32 %v1925_v60, %v1236_v36 }
 0x275   : > { %v1244_v0 = vmul.f32 %v1927_v62, %v1235_v20 }
 0x276   : > { %v1594_v22 = vadd.f32 -1.0, %v1239_v31 }
 0x277   : > { %1250 = vst [vmem:[%s489_s6] sm:$0x1] %v1244_v0 }
 0x278   : > { %v1245_v63 = vmul.f32 0.1, %v1594_v22  ;;  %1251 = vst [vmem:[%s3139_s30] sm:$0x1] %v1594_v22 }
 0x27a   : > { %v1246_v14 = vsub.f32 %v1244_v0, %v1245_v63 }
 0x27c   : > { %v1247_v3 = vsub.f32 0.0, %v1246_v14 }
 0x27e   : > { %1249 = vst [vmem:[%s483_s19] sm:$0x1] %v1247_v3 }
 0x27f PF: > { %s3180_s22 = sld [smem:[#allocation29_spill]]  ;;  %s1290_s5 = sshll.u32 %s483_s19, 4  ;;  %s1291_s5 = int_to_ptr.vmem [resolvable:$true] %s1290_s5 }
 0x280   : > { %s3182_s16 = sld [smem:[#allocation41_spill]]  ;;  %s1257_s11 = scalar_lea.sflag [#allocation16], %s2586_s18 }
 0x281   : > { %s2068_s1 = scalar_lea.vmem %s1291_s5, 16  ;;  %s2293_s23 = smov [#allocation15]  }
 0x282   : > { %p2069_p4 = scmp.ne.s32.totalorder %s1291_s5, %s2068_s1  ;;  %s2072_s9 = sshll.u32 %s2293_s23, 4  ;;  %s2073_s9 = int_to_ptr.vmem [resolvable:$false] %s2072_s9 }
 0x283   : > { %s2074_s13 = scalar_lea.vmem %s2073_s9, 32  ;;  %p2075_p10 = scmp.lt.s32.totalorder %s1291_s5, %s2073_s9 }
 0x284   : > { %p2070_p2 = pnand %p2069_p4, %p2412_p6  ;;  %p2076_p1 = scmp.lt.s32.totalorder %s2074_s13, %s2068_s1 }
 0x285   : > { %s2970_s17 = sshll.u32 %s3180_s22, 4 }
 0x286   : > { %s1288_s7 = scalar_lea.hbm %s3182_s16, %s2970_s17  ;;  %p2071_p8 = pneg %p2070_p2 }
 0x287   : > { %p2077_p7 = por %p2076_p1, %p2075_p10 }
 0x289   : > { %p2078_p12 = pnand %p2077_p7, %p2071_p8 }
 0x28b   : > { %2081 = shalt.err (!%p2078_p12)
}
 0x28c   : > { %s2082_s21 = scalar_lea.hbm %s1288_s7, 16  ;;  %s2086_s8 = scalar_lea.hbm %s3182_s16, 128 }
 0x28d   : > { %p2083_p3 = scmp.ne.s32.totalorder %s1288_s7, %s2082_s21  ;;  %p2087_p11 = scmp.lt.s32.totalorder %s1288_s7, %s3182_s16 }
 0x28e   : > { %p2088_p9 = scmp.lt.s32.totalorder %s2086_s8, %s2082_s21 }
 0x28f   : > { %p2084_p0 = pnand %p2083_p3, %p2412_p6 }
 0x290   : > { %p2089_p13 = por %p2088_p9, %p2087_p11 }
 0x291   : > { %p2085_p5 = pneg %p2084_p0 }
 0x293   : > { %p2090_p4 = pnand %p2089_p13, %p2085_p5 }
 0x295   : > { %2093 = shalt.err (!%p2090_p4)
}
 0x296   : > { %1702 = dma.vmem_to_hbm [thread:$0]  (%p2412_p6), %s1291_s5, 16, %s1288_s7, %s1257_s11  }
 0x297   : > { %s3183_s1 = sld [smem:[#allocation40_spill]]  ;;  %s1277_s9 = sshll.u32 %s477_s14, 4  ;;  %s1278_s9 = int_to_ptr.vmem [resolvable:$true] %s1277_s9 }
 0x298   : > { %s3184_s19 = sld [smem:[#allocation42_spill]]  ;;  %s1253_s8 = scalar_lea.sflag [#allocation7], %s2589_s12 }
 0x299   : > { %s2094_s20 = scalar_lea.vmem %s1278_s9, 16  ;;  %s2294_s7 = smov [#allocation14]  }
 0x29a   : > { %p2095_p2 = scmp.ne.s32.totalorder %s1278_s9, %s2094_s20  ;;  %s2098_s5 = sshll.u32 %s2294_s7, 4  ;;  %s2099_s5 = int_to_ptr.vmem [resolvable:$false] %s2098_s5 }
 0x29b   : > { %s2100_s22 = scalar_lea.vmem %s2099_s5, 32  ;;  %p2101_p1 = scmp.lt.s32.totalorder %s1278_s9, %s2099_s5 }
 0x29c   : > { %p2096_p8 = pnand %p2095_p2, %p2412_p6  ;;  %p2102_p7 = scmp.lt.s32.totalorder %s2100_s22, %s2094_s20 }
 0x29d   : > { %s2997_s23 = scalar_lea.hbm %s3183_s1, %s2970_s17 }
 0x29e   : > { %s3005_s25 = scalar_lea.hbm %s3184_s19, %s2970_s17  ;;  %p2097_p10 = pneg %p2096_p8 }
 0x29f   : > { %p2103_p12 = por %p2102_p7, %p2101_p1 }
 0x2a1   : > { %p2104_p3 = pnand %p2103_p12, %p2097_p10 }
 0x2a3   : > { %2107 = shalt.err (!%p2104_p3)
}
 0x2a4   : > { %s2108_s14 = scalar_lea.hbm %s2997_s23, 16  ;;  %s2112_s13 = scalar_lea.hbm %s3183_s1, 128 }
 0x2a5   : > { %p2109_p0 = scmp.ne.s32.totalorder %s2997_s23, %s2108_s14  ;;  %p2113_p9 = scmp.lt.s32.totalorder %s2997_s23, %s3183_s1 }
 0x2a6   : > { %p2114_p13 = scmp.lt.s32.totalorder %s2112_s13, %s2108_s14 }
 0x2a7   : > { %p2110_p5 = pnand %p2109_p0, %p2412_p6 }
 0x2a8   : > { %p2115_p4 = por %p2114_p13, %p2113_p9 }
 0x2a9   : > { %p2111_p11 = pneg %p2110_p5 }
 0x2ab   : > { %p2116_p2 = pnand %p2115_p4, %p2111_p11 }
 0x2ad   : > { %2119 = shalt.err (!%p2116_p2)
}
 0x2ae   : > { %1701 = dma.vmem_to_hbm [thread:$0]  (%p2412_p6), %s1278_s9, 16, %s2997_s23, %s1253_s8  }
 0x2af   : > { %s1303_s20 = sshll.u32 %s489_s6, 4  ;;  %s3185_s10 = sld [smem:[#allocation43_spill]]  ;;  %s1304_s20 = int_to_ptr.vmem [resolvable:$true] %s1303_s20 }
 0x2b0   : > { %s2120_s21 = scalar_lea.vmem %s1304_s20, 16  ;;  %s2295_s14 = smov [#allocation17]  }
 0x2b1   : > { %p2121_p8 = scmp.ne.s32.totalorder %s1304_s20, %s2120_s21  ;;  %s2124_s13 = sshll.u32 %s2295_s14, 4  ;;  %s2125_s13 = int_to_ptr.vmem [resolvable:$false] %s2124_s13 }
 0x2b2   : > { %s2126_s7 = scalar_lea.vmem %s2125_s13, 32  ;;  %p2127_p7 = scmp.lt.s32.totalorder %s1304_s20, %s2125_s13 }
 0x2b3   : > { %p2122_p10 = pnand %p2121_p8, %p2412_p6  ;;  %p2128_p12 = scmp.lt.s32.totalorder %s2126_s7, %s2120_s21 }
 0x2b5   : > { %s3186_s24 = smov %s3185_s10  ;;  %s3030_s30 = scalar_lea.hbm %s3185_s10, %s2970_s17 }
 0x2b6   : > { %p2123_p1 = pneg %p2122_p10  ;;  %p2129_p3 = por %p2128_p12, %p2127_p7 }
 0x2b8   : > { %p2130_p0 = pnand %p2129_p3, %p2123_p1 }
 0x2ba   : > { %2133 = shalt.err (!%p2130_p0)
}
 0x2bb   : > { %s2134_s6 = scalar_lea.hbm %s3005_s25, 16  ;;  %s2138_s9 = scalar_lea.hbm %s3184_s19, 128 }
 0x2bc   : > { %p2135_p5 = scmp.ne.s32.totalorder %s3005_s25, %s2134_s6  ;;  %p2139_p13 = scmp.lt.s32.totalorder %s3005_s25, %s3184_s19 }
 0x2bd   : > { %p2140_p4 = scmp.lt.s32.totalorder %s2138_s9, %s2134_s6 }
 0x2be   : > { %p2136_p11 = pnand %p2135_p5, %p2412_p6 }
 0x2bf   : > { %p2141_p2 = por %p2140_p4, %p2139_p13 }
 0x2c0   : > { %p2137_p9 = pneg %p2136_p11 }
 0x2c2   : > { %p2142_p8 = pnand %p2141_p2, %p2137_p9 }
 0x2c4   : > { %2145 = shalt.err (!%p2142_p8)
}
 0x2c5   : > { %1703 = dma.vmem_to_hbm [thread:$0]  (%p2412_p6), %s1304_s20, 16, %s3005_s25, %s1257_s11  }
 0x2c6   : > { %s3187_s22 = scalar_lea.vmem [#allocation18], %s2589_s12  ;;  %s1265_s21 = scalar_lea.sflag [#allocation19], %s2589_s12 }
 0x2c7   : > { %s1316_s10 = sshll.u32 %s3187_s22, 4  ;;  %s2296_s13 = smov [#allocation18]   ;;  %s1317_s10 = int_to_ptr.vmem [resolvable:$true] %s1316_s10 }
 0x2c8   : > { %s2146_s14 = scalar_lea.vmem %s1317_s10, 16  ;;  %s2150_s7 = sshll.u32 %s2296_s13, 4  ;;  %s2151_s7 = int_to_ptr.vmem [resolvable:$false] %s2150_s7 }
 0x2c9   : > { %p2147_p10 = scmp.ne.s32.totalorder %s1317_s10, %s2146_s14  ;;  %s2152_s6 = scalar_lea.vmem %s2151_s7, 32 }
 0x2ca   : > { %p2153_p12 = scmp.lt.s32.totalorder %s1317_s10, %s2151_s7  ;;  %p2154_p3 = scmp.lt.s32.totalorder %s2152_s6, %s2146_s14 }
 0x2cb   : > { %p2148_p1 = pnand %p2147_p10, %p2412_p6 }
 0x2cc   : > { %p2155_p0 = por %p2154_p3, %p2153_p12 }
 0x2cd   : > { %p2149_p7 = pneg %p2148_p1 }
 0x2cf   : > { %p2156_p5 = pnand %p2155_p0, %p2149_p7 }
 0x2d1   : > { %2159 = shalt.err (!%p2156_p5)
}
 0x2d2   : > { %s2160_s18 = scalar_lea.hbm %s3030_s30, 16  ;;  %s2164_s25 = scalar_lea.hbm %s3186_s24, 128 }
 0x2d3   : > { %p2161_p11 = scmp.ne.s32.totalorder %s3030_s30, %s2160_s18  ;;  %p2165_p4 = scmp.lt.s32.totalorder %s3030_s30, %s3186_s24 }
 0x2d4   : > { %p2166_p2 = scmp.lt.s32.totalorder %s2164_s25, %s2160_s18 }
 0x2d5   : > { %p2162_p9 = pnand %p2161_p11, %p2412_p6 }
 0x2d6   : > { %p2167_p8 = por %p2166_p2, %p2165_p4 }
 0x2d7   : > { %p2163_p13 = pneg %p2162_p9 }
 0x2d9   : > { %p2168_p10 = pnand %p2167_p8, %p2163_p13 }
 0x2db   : > { %2171 = shalt.err (!%p2168_p10)
}
 0x2dc   : > { %1704 = dma.vmem_to_hbm [thread:$0]  (%p2412_p6), %s1317_s10, 16, %s3030_s30, %s1265_s21  }
 0x2dd PF: > { %s3188_s23 = sld [smem:[#allocation34_spill]]  ;;  %p1739_p1 = scmp.ge.s32.totalorder %s2282_s15, 2 }
 0x2de   : > { %s1328_s9 = sand.u32 1, %s2242_s27  }
 0x2df   : > { %s1329_s8 = scalar_lea.sflag [#allocation7], %s1328_s9 }
 0x2e3   : > { %p3189_p7 = scmp.ne.s32.totalorder %s3188_s23, 0 }
 0x2e5   : > { %p1726_p12 = pnand %p1739_p1, %p3189_p7 }
 0x2e7   : > { %p1727_p3 = pneg %p1726_p12 }
 0x2e9   : > { %2229 = dma.done.wait (%p1727_p3), %s1329_s8, 16  }
 0x2ea   : > { %2231 = vsyncadd (%p1727_p3), %s1329_s8, 4294967280  ;;  %s3190_s5 = sadd.s32 4294967294, %s2282_s15  }
 0x2eb   : > { %s1336_s22 = sand.u32 1, %s3190_s5  }
 0x2ec   : > { %s1337_s14 = scalar_lea.sflag [#allocation16], %s1336_s22 }
 0x2ed   : > { %2233 = dma.done.wait (%p1727_p3), %s1337_s14, 32  }
 0x2ee   : > { %2235 = vsyncadd (%p1727_p3), %s1337_s14, 4294967264  ;;  %s1353_s26 = scalar_lea.sflag [#allocation19], %s1328_s9 }
 0x2ef   : > { %2237 = dma.done.wait (%p1727_p3), %s1353_s26, 16  }
 0x2f0   : > { %2239 = vsyncadd (%p1727_p3), %s1353_s26, 4294967280  ;;  %s37_s15 = sadd.s32 1, %s2282_s15   ;;  %s3191_s30 = sld [smem:[#allocation26_spill]] }
 0x2f1   : > { %p34_p6 = scmp.ge.s32.totalorder %s37_s15, 34   ;;  %s3192_s9 = sld [smem:[#allocation27_spill]] }
 0x2f2   : > { %s3193_s10 = sld [smem:[#allocation37_spill]]  ;;  %s3198_s27 = smov %s2246_s28 }
 0x2f3   : > { %s3194_s11 = sld [smem:[#allocation30_spill]]  ;;  %s3199_s28 = smov %s2250_s29 }
 0x2f4   : > { %s3195_s12 = sld [smem:[#allocation31_spill]]  ;;  %s3200_s29 = smov %s2524_s3 }
 0x2f5   : > { %s3196_s13 = sld [smem:[#allocation35_spill]]  ;;  %36 = sbr.rel (!%p34_p6) target bundleno = 24 (0x18), region = 190 }
 0x2f6   : > { %s3197_s14 = sld [smem:[#allocation36_spill]] }
 0x2fa   :  { %1357 = vsyncpa [#allocation6], 1 }
 0x2fb   :  { %1359 = vsyncpa [#allocation6 + $0x1], 1 }
 0x2fc   :  { %1360 = vsyncpa [#allocation9], 1 }
 0x2fd   :  { %1362 = vsyncpa [#allocation9 + $0x1], 1 }
 0x2fe   :  { %1363 = vsyncpa [#allocation12], 1 }
 0x2ff   :  { %1365 = vsyncpa [#allocation12 + $0x1], 1 }
 0x300   :  { %1366 = vsyncpa [#allocation7], 1 }
 0x301   :  { %1368 = vsyncpa [#allocation7 + $0x1], 1 }
 0x302   :  { %1369 = vsyncpa [#allocation16], 1 }
 0x303   :  { %1371 = vsyncpa [#allocation16 + $0x1], 1 }
 0x304   :  { %1372 = vsyncpa [#allocation19], 1 }
 0x305   :  { %1374 = vsyncpa [#allocation19 + $0x1], 1 }

</bundles_post_ra>
